<compile_context>
chip_gen: v6e
topology: v6e:2x2x1
jax: 0.10.0
libtpu: 0.0.40
codegen_flags: <defaults>
</compile_context>

<pallas_src>
import jax
import jax.numpy as jnp
from jax import lax
from jax.experimental import pallas as pl
from jax.experimental.pallas import tpu as pltpu


# ----------------------------- problem sizes ------------------------------ #
B          = 512                     # demo batch
BLOCK_B    = 256                     # batch tile per grid step (2 steps -> both TCs on v7x)
IN_FEAT    = 32                      # input features
HIDDEN     = 64                      # hidden width of the encoder MLP
HIDDEN_PAD = 128                     # lane-dense padded hidden width
D_Z        = 4                       # latent dimension
N_COMP     = 3                       # number of MoG components
C_OUT      = N_COMP * (2 * D_Z + 1)  # raw encoder_net output width = 27
MU_W       = N_COMP * D_Z            # 12 mu columns in the permuted layout
VAR_W      = N_COMP * D_Z            # 12 var columns
OUT_PAD    = 128                     # lane-dense packed output width (zero padded)
OUT_DTYPE  = jnp.bfloat16            # packed output dtype (halves HBM writeback)


def _softplus(x):
    # numerically-stable softplus, matches torch.nn.functional.softplus
    return jnp.maximum(x, 0.0) + jnp.log1p(jnp.exp(-jnp.abs(x)))


# ------------------------------ Pallas kernel ------------------------------ #
def mog_encoder_kernel(x_ref, w1_ref, b1_ref, w2_ref, packed_ref):
    """One batch tile per grid step.

    x_ref:      (BLOCK_B, IN_FEAT)       f32
    w1_ref:     (IN_FEAT, HIDDEN_PAD)    f32  hidden axis zero-padded 64->128
    b1_ref:     (1, HIDDEN_PAD)          f32  b1 in [:64], 1.0 at [64] (const-1 unit)
    w2_ref:     (HIDDEN_PAD, OUT_PAD)    f32  permuted [mu|var|pi|0-pad] cols,
                                              b2 folded into row HIDDEN (=64)
    packed_ref: (BLOCK_B, OUT_PAD)       bf16 [means(12) | stds(12) | pis(3) | 0]
    """
    # encoder_net: Linear -> ReLU -> Linear
    # TODO(synk): at production batch sizes cast x/h and weight tiles to bf16
    # before jnp.dot (keep preferred_element_type=f32) for the MXU fast path.
    h = jnp.dot(x_ref[...], w1_ref[...], preferred_element_type=jnp.float32)
    h = jnp.maximum(h + b1_ref[...], 0.0)        # VPU bias add; ReLU(1)=1 keeps bias unit
    out = jnp.dot(h, w2_ref[...], preferred_element_type=jnp.float32)

    # stds = clamp(sqrt(softplus(var) + 1e-8), 1e-5, 1e5) only on var lanes;
    # mu / pi / zero-pad lanes pass through `out` unchanged (pad stays exact 0).
    col = lax.broadcasted_iota(jnp.int32, out.shape, 1)
    var_lanes = (col >= MU_W) & (col < MU_W + VAR_W)
    std = jnp.clip(jnp.sqrt(_softplus(out) + 1e-8), 1e-5, 1e5)   # f32 epilogue

    # single full-width (lane-dense, unmasked) store; cast only at the store
    packed_ref[...] = jnp.where(var_lanes, std, out).astype(packed_ref.dtype)


# --------------------------- host-side param prep -------------------------- #
def prepare_params(w1, b1, w2, b2):
    """One-time host-side permutation / padding / b2 fold (free)."""
    w1 = w1.astype(jnp.float32)
    b1 = jnp.reshape(b1, (-1,)).astype(jnp.float32)
    w2 = w2.astype(jnp.float32)
    b2 = jnp.reshape(b2, (-1,)).astype(jnp.float32)

    # column permutation: interleaved [mu_k|var_k|pi_k]*3 -> [mu*|var*|pi*]
    stride = 2 * D_Z + 1
    perm = []
    for k in range(N_COMP):
        perm += list(range(k * stride, k * stride + D_Z))              # mu_k
    for k in range(N_COMP):
        perm += list(range(k * stride + D_Z, k * stride + 2 * D_Z))    # var_k
    for k in range(N_COMP):
        perm += [k * stride + 2 * D_Z]                                 # pi_k
    perm = jnp.asarray(perm, dtype=jnp.int32)

    w2p = jnp.pad(w2[:, perm], ((0, 0), (0, OUT_PAD - C_OUT)))         # (HIDDEN, 128)
    b2p = jnp.pad(b2[perm], (0, OUT_PAD - C_OUT))                      # (128,)

    # hidden axis padded 64 -> 128; unit HIDDEN becomes the constant-1 bias unit
    w1_aug = jnp.zeros((IN_FEAT, HIDDEN_PAD), jnp.float32)
    w1_aug = w1_aug.at[:, :HIDDEN].set(w1)

    b1_aug = jnp.zeros((1, HIDDEN_PAD), jnp.float32)
    b1_aug = b1_aug.at[0, :HIDDEN].set(b1)
    b1_aug = b1_aug.at[0, HIDDEN].set(1.0)      # ReLU(0 + 1) = 1 -> const-1 hidden unit

    w2_aug = jnp.zeros((HIDDEN_PAD, OUT_PAD), jnp.float32)
    w2_aug = w2_aug.at[:HIDDEN, :].set(w2p)
    w2_aug = w2_aug.at[HIDDEN, :].set(b2p)      # b2 folded via the constant-1 unit
    return w1_aug, b1_aug, w2_aug


# ------------------------------ JAX wrapper -------------------------------- #
class MixtureOfGaussiansParams:
    """Lightweight container matching the torch MixtureOfGaussians parameterization."""

    def __init__(self, mixture_logits, means, stds, temperature=0.1):
        self.mixture_logits = mixture_logits   # (B, N_COMP)
        self.means = means                     # (B, N_COMP, D_Z)
        self.stds = stds                       # (B, N_COMP, D_Z)
        self.temperature = temperature

    @property
    def mean(self):
        w = jax.nn.softmax(self.mixture_logits, axis=-1)[..., None]
        return jnp.sum(w * self.means, axis=-2)


@jax.jit
def _mog_encoder_pallas(x, w1_aug, b1_aug, w2_aug):
    bsz = x.shape[0]
    bsz_p = -(-bsz // BLOCK_B) * BLOCK_B        # round batch up to a tile multiple

    x = x.astype(jnp.float32)
    if bsz_p != bsz:                            # pad rows are sliced off below
        x = jnp.pad(x, ((0, bsz_p - bsz), (0, 0)))

    packed = pl.pallas_call(
        mog_encoder_kernel,
        out_shape=jax.ShapeDtypeStruct((bsz_p, OUT_PAD), OUT_DTYPE),
        grid_spec=pltpu.PrefetchScalarGridSpec(
            num_scalar_prefetch=0,
            grid=(bsz_p // BLOCK_B,),
            in_specs=[
                pl.BlockSpec((BLOCK_B, IN_FEAT), lambda i: (i, 0)),       # x tile
                pl.BlockSpec((IN_FEAT, HIDDEN_PAD), lambda i: (0, 0)),    # resident W1
                pl.BlockSpec((1, HIDDEN_PAD), lambda i: (0, 0)),          # resident b1
                pl.BlockSpec((HIDDEN_PAD, OUT_PAD), lambda i: (0, 0)),    # resident W2
            ],
            out_specs=pl.BlockSpec((BLOCK_B, OUT_PAD), lambda i: (i, 0)),
        ),
        compiler_params=pltpu.CompilerParams(
            dimension_semantics=("parallel",)),   # batch axis shards over TCs on v7x
    )(x, w1_aug, b1_aug, w2_aug)

    # minimal post-processing: one contiguous slice+reshape for mu/std, one for pi
    musd = packed[:bsz, :2 * MU_W].astype(jnp.float32).reshape(bsz, 2, N_COMP, D_Z)
    pis = packed[:bsz, 2 * MU_W:2 * MU_W + N_COMP].astype(jnp.float32)
    return pis, musd[:, 0], musd[:, 1]


def mog_encoder_forward(x, prepared_params):
    w1_aug, b1_aug, w2_aug = prepared_params
    pis, means, stds = _mog_encoder_pallas(x, w1_aug, b1_aug, w2_aug)
    return MixtureOfGaussiansParams(pis, means, stds)


# --------------------------- pure-JAX reference ---------------------------- #
def mog_encoder_reference(x, raw_params):
    """Direct transcription of the torch forward (unpermuted params, f32)."""
    w1, b1, w2, b2 = raw_params
    h = jnp.maximum(x @ w1 + b1, 0.0)
    out = h @ w2 + b2
    stride = 2 * D_Z + 1
    mu_l, var_l, pi_l = [], [], []
    for k in range(N_COMP):
        chunk = out[:, k * stride:(k + 1) * stride]
        p = chunk[:, :-1]
        pi_l.append(chunk[:, -1])
        mu_l.append(p[:, :D_Z])
        var_l.append(p[:, D_Z:])
    means = jnp.stack(mu_l, axis=1)
    stds = jnp.clip(jnp.sqrt(jax.nn.softplus(jnp.stack(var_l, axis=1)) + 1e-8),
                    1e-5, 1e5)
    pis = jnp.stack(pi_l, axis=1)
    return pis, means, stds


# ----------------------------------- main ----------------------------------- #
if __name__ == "__main__":
    key = jax.random.PRNGKey(0)
    kx, k1, k2, k3, k4 = jax.random.split(key, 5)

    # deterministic "encoder_net" parameters (2-layer MLP)
    w1 = jax.random.normal(k1, (IN_FEAT, HIDDEN), jnp.float32) / jnp.sqrt(IN_FEAT)
    b1 = 0.01 * jax.random.normal(k2, (HIDDEN,), jnp.float32)
    w2 = jax.random.normal(k3, (HIDDEN, C_OUT), jnp.float32) / jnp.sqrt(HIDDEN)
    b2 = 0.01 * jax.random.normal(k4, (C_OUT,), jnp.float32)

    x = jax.random.normal(kx, (B, IN_FEAT), jnp.float32)

    # one-time host-side weight permutation / padding / bias folding
    prepared = prepare_params(w1, b1, w2, b2)

    dist = mog_encoder_forward(x, prepared)
    jax.block_until_ready((dist.mixture_logits, dist.means, dist.stds))

    # correctness vs a pure-JAX f32 transcription of the torch forward.
    # Tolerance reflects the bf16 rounding of the packed output store only
    # (all matmuls and the softplus/sqrt/clip epilogue run in f32).
    pis_ref, means_ref, stds_ref = mog_encoder_reference(x, (w1, b1, w2, b2))
    assert jnp.allclose(dist.mixture_logits, pis_ref, atol=2e-2, rtol=2e-2)
    assert jnp.allclose(dist.means, means_ref, atol=2e-2, rtol=2e-2)
    assert jnp.allclose(dist.stds, stds_ref, atol=2e-2, rtol=2e-2)

    print("KERNEL_OK")
</pallas_src>

<mosaic_0001>
module attributes {stable_mosaic.version = 11 : i64} {
  func.func @mog_encoder_kernel(%arg0: i32, %arg1: memref<256x32xf32, #tpu.memory_space<vmem>>, %arg2: memref<32x128xf32, #tpu.memory_space<vmem>>, %arg3: memref<1x128xf32, #tpu.memory_space<vmem>>, %arg4: memref<128x128xf32, #tpu.memory_space<vmem>>, %arg5: memref<256x128xbf16, #tpu.memory_space<vmem>>) attributes {dimension_semantics = [#tpu.dimension_semantics<parallel>], iteration_bounds = array<i64: 2>, scalar_prefetch = 0 : i64, scratch_operands = 0 : i64, tpu.core_type = #tpu.core_type<tc>, window_params = [{transform_indices = @transform_0, window_bounds = array<i64: 256, 32>}, {pipeline_mode = #tpu.pipeline_mode<synchronous>, transform_indices = @transform_1, window_bounds = array<i64: 32, 128>}, {pipeline_mode = #tpu.pipeline_mode<synchronous>, transform_indices = @transform_2, window_bounds = array<i64: 1, 128>}, {pipeline_mode = #tpu.pipeline_mode<synchronous>, transform_indices = @transform_3, window_bounds = array<i64: 128, 128>}, {transform_indices = @transform_4, window_bounds = array<i64: 256, 128>}]} {
    %c0 = arith.constant 0 : index
    %c0_0 = arith.constant 0 : index
    %0 = vector.load %arg1[%c0, %c0_0] : memref<256x32xf32, #tpu.memory_space<vmem>>, vector<256x32xf32>
    %c0_1 = arith.constant 0 : index
    %c0_2 = arith.constant 0 : index
    %1 = vector.load %arg2[%c0_1, %c0_2] : memref<32x128xf32, #tpu.memory_space<vmem>>, vector<32x128xf32>
    %cst = arith.constant dense<0.000000e+00> : vector<256x128xf32>
    %2 = tpu.matmul %0, %1, %cst {dimension_numbers = #tpu.dot_dimension_numbers<[1], [0], [0], [1], [0, 0, 1, 1], [], []>} : vector<256x32xf32>, vector<32x128xf32>, vector<256x128xf32> -> vector<256x128xf32>
    %c0_3 = arith.constant 0 : index
    %c0_4 = arith.constant 0 : index
    %3 = vector.load %arg3[%c0_3, %c0_4] : memref<1x128xf32, #tpu.memory_space<vmem>>, vector<1x128xf32>
    %4 = vector.broadcast %3 : vector<1x128xf32> to vector<256x128xf32>
    %5 = arith.addf %2, %4 : vector<256x128xf32>
    %cst_5 = arith.constant 0.000000e+00 : f32
    %6 = vector.broadcast %cst_5 : f32 to vector<256x128xf32>
    %7 = arith.maximumf %5, %6 : vector<256x128xf32>
    %c0_6 = arith.constant 0 : index
    %c0_7 = arith.constant 0 : index
    %8 = vector.load %arg4[%c0_6, %c0_7] : memref<128x128xf32, #tpu.memory_space<vmem>>, vector<128x128xf32>
    %cst_8 = arith.constant dense<0.000000e+00> : vector<256x128xf32>
    %9 = tpu.matmul %7, %8, %cst_8 {dimension_numbers = #tpu.dot_dimension_numbers<[1], [0], [0], [1], [0, 0, 1, 1], [], []>} : vector<256x128xf32>, vector<128x128xf32>, vector<256x128xf32> -> vector<256x128xf32>
    %10 = tpu.iota {dimensions = array<i32: 1>} : vector<256x128xi32>
    %c12_i32 = arith.constant 12 : i32
    %11 = vector.broadcast %c12_i32 : i32 to vector<256x128xi32>
    %12 = arith.cmpi sge, %10, %11 : vector<256x128xi32>
    %c24_i32 = arith.constant 24 : i32
    %13 = vector.broadcast %c24_i32 : i32 to vector<256x128xi32>
    %14 = arith.cmpi slt, %10, %13 : vector<256x128xi32>
    %15 = arith.andi %12, %14 : vector<256x128xi1>
    %cst_9 = arith.constant 0.000000e+00 : f32
    %16 = vector.broadcast %cst_9 : f32 to vector<256x128xf32>
    %17 = arith.maximumf %9, %16 : vector<256x128xf32>
    %18 = math.absf %9 : vector<256x128xf32>
    %cst_10 = arith.constant 0.000000e+00 : f32
    %19 = vector.broadcast %cst_10 : f32 to vector<256x128xf32>
    %20 = arith.subf %19, %18 : vector<256x128xf32>
    %21 = math.exp %20 : vector<256x128xf32>
    %22 = math.log1p %21 : vector<256x128xf32>
    %23 = arith.addf %17, %22 : vector<256x128xf32>
    %cst_11 = arith.constant 9.99999993E-9 : f32
    %24 = vector.broadcast %cst_11 : f32 to vector<256x128xf32>
    %25 = arith.addf %23, %24 : vector<256x128xf32>
    %26 = math.sqrt %25 : vector<256x128xf32>
    %cst_12 = arith.constant 9.99999974E-6 : f32
    %cst_13 = arith.constant 1.000000e+05 : f32
    %27 = vector.broadcast %cst_12 : f32 to vector<256x128xf32>
    %28 = arith.maximumf %27, %26 : vector<256x128xf32>
    %29 = vector.broadcast %cst_13 : f32 to vector<256x128xf32>
    %30 = arith.minimumf %29, %28 : vector<256x128xf32>
    %31 = arith.select %15, %30, %9 : vector<256x128xi1>, vector<256x128xf32>
    %32 = arith.truncf %31 : vector<256x128xf32> to vector<256x128xbf16>
    %c0_14 = arith.constant 0 : index
    %c0_15 = arith.constant 0 : index
    %33 = vector.load %arg5[%c0_14, %c0_15] : memref<256x128xbf16, #tpu.memory_space<vmem>>, vector<256x128xbf16>
    tpu.vector_store %arg5[%c0_14, %c0_15], %32 {strides = array<i32>} : memref<256x128xbf16, #tpu.memory_space<vmem>>, vector<256x128xbf16>,
    return
  }
  func.func @transform_0(%arg0: i32) -> (i32, i32) {
    %c0_i32 = arith.constant 0 : i32
    %c0_i32_0 = arith.constant 0 : i32
    return %arg0, %c0_i32 : i32, i32
  }
  func.func @transform_1(%arg0: i32) -> (i32, i32) {
    %c0_i32 = arith.constant 0 : i32
    %c0_i32_0 = arith.constant 0 : i32
    %c0_i32_1 = arith.constant 0 : i32
    return %c0_i32, %c0_i32_0 : i32, i32
  }
  func.func @transform_2(%arg0: i32) -> (i32, i32) {
    %c0_i32 = arith.constant 0 : i32
    %c0_i32_0 = arith.constant 0 : i32
    %c0_i32_1 = arith.constant 0 : i32
    return %c0_i32, %c0_i32_0 : i32, i32
  }
  func.func @transform_3(%arg0: i32) -> (i32, i32) {
    %c0_i32 = arith.constant 0 : i32
    %c0_i32_0 = arith.constant 0 : i32
    %c0_i32_1 = arith.constant 0 : i32
    return %c0_i32, %c0_i32_0 : i32, i32
  }
  func.func @transform_4(%arg0: i32) -> (i32, i32) {
    %c0_i32 = arith.constant 0 : i32
    %c0_i32_0 = arith.constant 0 : i32
    return %arg0, %c0_i32 : i32, i32
  }
}

</mosaic_0001>

<bundles_post_ra>
// kernel: _mog_encoder_pallas.1
= control target key start
LH: loop header
LB: loop body
LE: loop exit
PB: predicated region body
PF: predicated region fallthrough
CT: control target
= control target key end

     0   :  { %s2580_s15 = smov 0   ;;  %s3686_s0 = inlined_call_operand.vmem [shape: f32[512,32], index: 0, kind: input, shape index: {}]   ;;  %s3687_s1 = inlined_call_operand.vmem [shape: f32[32,128], index: 1, kind: input, shape index: {}]   ;;  %s3688_s2 = inlined_call_operand.vmem [shape: f32[1,128], index: 2, kind: input, shape index: {}]   ;;  %s3689_s3 = inlined_call_operand.vmem [shape: f32[128,128], index: 3, kind: input, shape index: {}]   ;;  %s3690_s4 = inlined_call_operand.vmem [shape: bf16[512,128], index: 4, kind: output, shape index: {}]  }
   0x1 LB: > { %s1892_s16 = sadd.s32 4294967295, %s2553_s15   ;;  %p1896_p0 = scmp.ge.s32.totalorder %s2553_s15, 1  ;;  %s2553_s15 = sphi %s2580_s15, %s14_s15  }
   0x2   : > { %p163_p1 = scmp.lt.s32.totalorder %s2553_s15, 3 }
   0x4   : > { %p164_p2 = pnand %p1896_p0, %p163_p1 }
   0x5   : > { %s1897_s21 = sshll.u32 (!%p164_p2), %s1892_s16, 5 }
   0x6   : > { %167 = sbr.rel (%p164_p2) target bundleno = 655 (0x28f), region = 36  ;;  %p190_p3 = scmp.lt.s32.totalorder (!%p164_p2), %s1897_s21, 63 }
   0xb   : > { %v236_v0 = vld [vmem:[%s3687_s1 + $0x18] sm:$0xff]  ;;  %v235_v1 = vld [vmem:[%s3687_s1 + $0x10] sm:$0xff]  ;;  %v234_v3 = vld [vmem:[%s3687_s1 + $0x8] sm:$0xff]  ;;  %s3740_s21 = smov (!%p190_p3, %s1897_s21), 63  ;;  %vm244_vm0 = vcmask 261120  }
   0xc   : > { %2179 = vmatprep.subr.mxu0 %v236_v0  ;;  %v613_v2 = vld [vmem:[%s3689_s3 + $0x78] sm:$0xff]  ;;  %v612_v4 = vld [vmem:[%s3689_s3 + $0x70] sm:$0xff]  ;;  %v233_v5 = vld [vmem:[%s3687_s1] sm:$0xff]  ;;  %s1898_s30 = sshll.u32 %s3740_s21, 3  ;;  %s1900_s14 = sshll.u32 %s3740_s21, 2 }
   0xd   : > { %2180 = vmatpush3.msra.mxu0 %v236_v0  ;;  %2315 = vmatprep.subr.mxu1 %v613_v2  ;;  %v611_v6 = vld [vmem:[%s3689_s3 + $0x68] sm:$0xff]  ;;  %s2615_s9 = scalar_lea.vmem %s3686_s0, %s1898_s30  ;;  %v610_v11 = vld [vmem:[%s3689_s3 + $0x60] sm:$0xff]  ;;  %v609_v14 = vld [vmem:[%s3689_s3 + $0x58] sm:$0xff]  ;;  %s3037_s17 = scalar_lea.vmem %s3690_s4, %s1900_s14 }
   0xe   : > { %2181 = vmatprep.subr.mxu0 %v235_v1  ;;  %2331 = vmatpush3.msra.mxu1 %v613_v2  ;;  %v201_v7 = vld [vmem:[%s2615_s9] sm:$0xff]  ;;  %v202_v8 = vld [vmem:[%s2615_s9 + $0x8] sm:$0xff]  ;;  %v203_v9 = vld [vmem:[%s2615_s9 + $0x10] sm:$0xff] }
   0xf   : > { %2182 = vmatpush3.msra.mxu0 %v235_v1  ;;  %2316 = vmatprep.subr.mxu1 %v612_v4  ;;  %v204_v10 = vld [vmem:[%s2615_s9 + $0x18] sm:$0xff]  ;;  %v205_v12 = vld [vmem:[%s2615_s9 + $0x20] sm:$0xff]  ;;  %v206_v13 = vld [vmem:[%s2615_s9 + $0x28] sm:$0xff] }
  0x10   : > { %2183 = vmatprep.subr.mxu0 %v234_v3  ;;  %2332 = vmatpush3.msra.mxu1 %v612_v4  ;;  %v207_v15 = vld [vmem:[%s2615_s9 + $0x30] sm:$0xff]  ;;  %v208_v17 = vld [vmem:[%s2615_s9 + $0x38] sm:$0xff]  ;;  %v607_v18 = vld [vmem:[%s3689_s3 + $0x48] sm:$0xff] }
  0x11   : > { %2184 = vmatpush3.msra.mxu0 %v234_v3  ;;  %2317 = vmatprep.subr.mxu1 %v611_v6  ;;  %v608_v16 = vld [vmem:[%s3689_s3 + $0x50] sm:$0xff]  ;;  %v209_v19 = vld [vmem:[%s2615_s9 + $0x40] sm:$0xff]  ;;  %v210_v21 = vld [vmem:[%s2615_s9 + $0x48] sm:$0xff] }
  0x12   : > { %2185 = vmatprep.subr.mxu0 %v233_v5  ;;  %2333 = vmatpush3.msra.mxu1 %v611_v6  ;;  %v606_v20 = vld [vmem:[%s3689_s3 + $0x40] sm:$0xff]  ;;  %v605_v22 = vld [vmem:[%s3689_s3 + $0x38] sm:$0xff]  ;;  %v211_v23 = vld [vmem:[%s2615_s9 + $0x50] sm:$0xff] }
  0x13   : > { %2186 = vmatpush3.msra.mxu0 %v233_v5  ;;  %2187 = vmatprep.mubr.msk.f32.mxu0 %vm244_vm0, %v201_v7  ;;  %v604_v24 = vld [vmem:[%s3689_s3 + $0x30] sm:$0xff]  ;;  %v212_v25 = vld [vmem:[%s2615_s9 + $0x58] sm:$0xff]  ;;  %v603_v26 = vld [vmem:[%s3689_s3 + $0x28] sm:$0xff] }
  0x14   : > { %2188 = vmatmul.mubr.msk.f32.vlgmr.msra.gmra.mxu0 %vm244_vm0, %v202_v8  ;;  %2235 = vmatprep.subr.mxu0 %v613_v2  ;;  %v213_v27 = vld [vmem:[%s2615_s9 + $0x60] sm:$0xff]  ;;  %v214_v29 = vld [vmem:[%s2615_s9 + $0x68] sm:$0xff]  ;;  %v215_v30 = vld [vmem:[%s2615_s9 + $0x70] sm:$0xff] }
  0x15   : > { %2190 = vmatprep.mubr.msk.f32.mxu0 %vm244_vm0, %v203_v9  ;;  %2236 = vmatpush3.msra.mxu0 %v613_v2  ;;  %v602_v28 = vld [vmem:[%s3689_s3 + $0x20] sm:$0xff]  ;;  %v216_v31 = vld [vmem:[%s2615_s9 + $0x78] sm:$0xff]  ;;  %v218_v33 = vld [vmem:[%s2615_s9 + $0x88] sm:$0xff] }
  0x16   : > { %2237 = vmatprep.subr.mxu0 %v612_v4  ;;  %2318 = vmatprep.subr.mxu1 %v610_v11  ;;  %v217_v32 = vld [vmem:[%s2615_s9 + $0x80] sm:$0xff]  ;;  %v219_v34 = vld [vmem:[%s2615_s9 + $0x90] sm:$0xff]  ;;  %v220_v35 = vld [vmem:[%s2615_s9 + $0x98] sm:$0xff] }
  0x17   : > { %2238 = vmatpush3.msra.mxu0 %v612_v4  ;;  %2334 = vmatpush3.msra.mxu1 %v610_v11  ;;  %v221_v36 = vld [vmem:[%s2615_s9 + $0xa0] sm:$0xff]  ;;  %v222_v37 = vld [vmem:[%s2615_s9 + $0xa8] sm:$0xff]  ;;  %v223_v38 = vld [vmem:[%s2615_s9 + $0xb0] sm:$0xff] }
  0x18   : > { %2191 = vmatmul.mubr.msk.f32.gmra.mxu0 %vm244_vm0, %v204_v10  ;;  %2239 = vmatprep.subr.mxu0 %v611_v6  ;;  %v224_v39 = vld [vmem:[%s2615_s9 + $0xb8] sm:$0xff]  ;;  %v225_v40 = vld [vmem:[%s2615_s9 + $0xc0] sm:$0xff]  ;;  %v226_v41 = vld [vmem:[%s2615_s9 + $0xc8] sm:$0xff] }
  0x19   : > { %2193 = vmatprep.mubr.msk.f32.mxu0 %vm244_vm0, %v205_v12  ;;  %2240 = vmatpush3.msra.mxu0 %v611_v6  ;;  %v227_v42 = vld [vmem:[%s2615_s9 + $0xd0] sm:$0xff]  ;;  %v228_v43 = vld [vmem:[%s2615_s9 + $0xd8] sm:$0xff]  ;;  %v229_v44 = vld [vmem:[%s2615_s9 + $0xe0] sm:$0xff] }
  0x1a   : > { %2241 = vmatprep.subr.mxu0 %v610_v11  ;;  %2319 = vmatprep.subr.mxu1 %v609_v14  ;;  %v230_v45 = vld [vmem:[%s2615_s9 + $0xe8] sm:$0xff]  ;;  %v231_v46 = vld [vmem:[%s2615_s9 + $0xf0] sm:$0xff]  ;;  %v232_v47 = vld [vmem:[%s2615_s9 + $0xf8] sm:$0xff] }
  0x1b   : > { %2242 = vmatpush3.msra.mxu0 %v610_v11  ;;  %2335 = vmatpush3.msra.mxu1 %v609_v14  ;;  %v601_v48 = vld [vmem:[%s3689_s3 + $0x18] sm:$0xff]  ;;  %v600_v49 = vld [vmem:[%s3689_s3 + $0x10] sm:$0xff]  ;;  %v599_v50 = vld [vmem:[%s3689_s3 + $0x8] sm:$0xff] }
  0x1c   : > { %2194 = vmatmul.mubr.msk.f32.gmra.mxu0 %vm244_vm0, %v206_v13  ;;  %2243 = vmatprep.subr.mxu0 %v609_v14  ;;  %v598_v51 = vld [vmem:[%s3689_s3] sm:$0xff] }
  0x1d   : > { %2196 = vmatprep.mubr.msk.f32.mxu0 %vm244_vm0, %v207_v15  ;;  %2244 = vmatpush3.msra.mxu0 %v609_v14  ;;  %v2723_v52 = vld [vmem:[%s3688_s2] ss:$0 sm:$0xff] }
  0x1e   : > { %2245 = vmatprep.subr.mxu0 %v608_v16  ;;  %2320 = vmatprep.subr.mxu1 %v608_v16 }
  0x1f   : > { %2246 = vmatpush3.msra.mxu0 %v608_v16  ;;  %2336 = vmatpush3.msra.mxu1 %v608_v16 }
  0x20   : > { %2197 = vmatmul.mubr.msk.f32.gmra.mxu0 %vm244_vm0, %v208_v17  ;;  %2247 = vmatprep.subr.mxu0 %v607_v18 }
  0x21   : > { %2199 = vmatprep.mubr.msk.f32.mxu0 %vm244_vm0, %v209_v19  ;;  %2248 = vmatpush3.msra.mxu0 %v607_v18 }
  0x22   : > { %2249 = vmatprep.subr.mxu0 %v606_v20  ;;  %2321 = vmatprep.subr.mxu1 %v607_v18 }
  0x23   : > { %2250 = vmatpush3.msra.mxu0 %v606_v20  ;;  %2337 = vmatpush3.msra.mxu1 %v607_v18 }
  0x24   : > { %2200 = vmatmul.mubr.msk.f32.gmra.mxu0 %vm244_vm0, %v210_v21  ;;  %2251 = vmatprep.subr.mxu0 %v605_v22 }
  0x25   : > { %2202 = vmatprep.mubr.msk.f32.mxu0 %vm244_vm0, %v211_v23  ;;  %2252 = vmatpush3.msra.mxu0 %v605_v22 }
  0x26   : > { %2253 = vmatprep.subr.mxu0 %v604_v24  ;;  %2322 = vmatprep.subr.mxu1 %v606_v20 }
  0x27   : > { %2254 = vmatpush3.msra.mxu0 %v604_v24  ;;  %2338 = vmatpush3.msra.mxu1 %v606_v20 }
  0x28   : > { %2203 = vmatmul.mubr.msk.f32.gmra.mxu0 %vm244_vm0, %v212_v25  ;;  %2255 = vmatprep.subr.mxu0 %v603_v26 }
  0x29   : > { %2205 = vmatprep.mubr.msk.f32.mxu0 %vm244_vm0, %v213_v27  ;;  %2256 = vmatpush3.msra.mxu0 %v603_v26 }
  0x2a   : > { %2257 = vmatprep.subr.mxu0 %v602_v28  ;;  %2323 = vmatprep.subr.mxu1 %v605_v22 }
  0x2b   : > { %2258 = vmatpush3.msra.mxu0 %v602_v28  ;;  %2339 = vmatpush3.msra.mxu1 %v605_v22 }
  0x2c   : > { %2206 = vmatmul.mubr.msk.f32.gmra.mxu0 %vm244_vm0, %v214_v29  ;;  %2324 = vmatprep.subr.mxu1 %v604_v24 }
  0x2d   : > { %2208 = vmatprep.mubr.msk.f32.mxu0 %vm244_vm0, %v215_v30  ;;  %2340 = vmatpush3.msra.mxu1 %v604_v24 }
  0x2e   : > { %2325 = vmatprep.subr.mxu1 %v603_v26  ;;  %2259 = vmatprep.subr.mxu0 %v601_v48 }
  0x2f   : > { %2341 = vmatpush3.msra.mxu1 %v603_v26  ;;  %2260 = vmatpush3.msra.mxu0 %v601_v48 }
  0x30   : > { %2209 = vmatmul.mubr.msk.f32.gmra.mxu0 %vm244_vm0, %v216_v31  ;;  %2326 = vmatprep.subr.mxu1 %v602_v28 }
  0x31   : > { %2211 = vmatprep.mubr.msk.f32.mxu0 %vm244_vm0, %v217_v32  ;;  %2342 = vmatpush3.msra.mxu1 %v602_v28 }
  0x32   : > { %2327 = vmatprep.subr.mxu1 %v601_v48  ;;  %2261 = vmatprep.subr.mxu0 %v600_v49 }
  0x33   : > { %2343 = vmatpush3.msra.mxu1 %v601_v48  ;;  %2262 = vmatpush3.msra.mxu0 %v600_v49 }
  0x34   : > { %2212 = vmatmul.mubr.msk.f32.gmra.mxu0 %vm244_vm0, %v218_v33  ;;  %2328 = vmatprep.subr.mxu1 %v600_v49 }
  0x35   : > { %2214 = vmatprep.mubr.msk.f32.mxu0 %vm244_vm0, %v219_v34  ;;  %2344 = vmatpush3.msra.mxu1 %v600_v49 }
  0x36   : > { %2263 = vmatprep.subr.mxu0 %v599_v50  ;;  %2329 = vmatprep.subr.mxu1 %v599_v50 }
  0x37   : > { %2264 = vmatpush3.msra.mxu0 %v599_v50  ;;  %2345 = vmatpush3.msra.mxu1 %v599_v50 }
  0x38   : > { %2215 = vmatmul.mubr.msk.f32.gmra.mxu0 %vm244_vm0, %v220_v35  ;;  %2265 = vmatprep.subr.mxu0 %v598_v51 }
  0x39   : > { %2217 = vmatprep.mubr.msk.f32.mxu0 %vm244_vm0, %v221_v36  ;;  %2330 = vmatprep.subr.mxu1 %v598_v51 }
  0x3a   : > { %2266 = vmatpush3.msra.mxu0 %v598_v51  ;;  %2346 = vmatpush3.msra.mxu1 %v598_v51 }
  0x3c   : > { %2218 = vmatmul.mubr.msk.f32.gmra.mxu0 %vm244_vm0, %v222_v37 }
  0x3d   : > { %2220 = vmatprep.mubr.msk.f32.mxu0 %vm244_vm0, %v223_v38 }
  0x40   : > { %2221 = vmatmul.mubr.msk.f32.gmra.mxu0 %vm244_vm0, %v224_v39 }
  0x41   : > { %2223 = vmatprep.mubr.msk.f32.mxu0 %vm244_vm0, %v225_v40 }
  0x44   : > { %2224 = vmatmul.mubr.msk.f32.gmra.mxu0 %vm244_vm0, %v226_v41 }
  0x45   : > { %2226 = vmatprep.mubr.msk.f32.mxu0 %vm244_vm0, %v227_v42 }
  0x48   : > { %2227 = vmatmul.mubr.msk.f32.gmra.mxu0 %vm244_vm0, %v228_v43 }
  0x49   : > { %2229 = vmatprep.mubr.msk.f32.mxu0 %vm244_vm0, %v229_v44 }
  0x4c   : > { %2230 = vmatmul.mubr.msk.f32.gmra.mxu0 %vm244_vm0, %v230_v45 }
  0x4d   : > { %2232 = vmatprep.mubr.msk.f32.mxu0 %vm244_vm0, %v231_v46 }
  0x50   : > { %2233 = vmatmul.mubr.msk.f32.gmra.mxu0 %vm244_vm0, %v232_v47 }
  0xd4   : > { %v2189_v53 = vpop.f32.mrf.mxu0 }
  0xd5   : > { %v413_v54 = vadd.f32 %v2189_v53, %v2723_v52 }
  0xd6   : > { %v407_v55 = vpop.f32.mrf.mxu0 }
  0xd7   : > { %v408_v56 = vadd.f32 %v2723_v52, %v407_v55  ;;  %v567_v59 = vmax.f32 %v413_v54, 0.0 }
  0xd8   : > { %v2192_v57 = vpop.f32.mrf.mxu0 }
  0xd9   : > { %v566_v58 = vmax.f32 %v408_v56, 0.0  ;;  %v423_v60 = vadd.f32 %v2192_v57, %v2723_v52 }
  0xda   : > { %v417_v61 = vpop.f32.mrf.mxu0 }
  0xdb   : > { %v418_v62 = vadd.f32 %v2723_v52, %v417_v61  ;;  %2267 = vmatprep.mubr.f32.mxu0 %v566_v58  ;;  %v569_v1 = vmax.f32 %v423_v60, 0.0 }
  0xdc   : > { %v2195_v63 = vpop.f32.mrf.mxu0  ;;  %2268 = vmatmul.mubr.f32.vlgmr.msra.gmra.mxu0 %v567_v59 }
  0xdd   : > { %v568_v0 = vmax.f32 %v418_v62, 0.0  ;;  %v433_v2 = vadd.f32 %v2195_v63, %v2723_v52 }
  0xde   : > { %v427_v3 = vpop.f32.mrf.mxu0 }
  0xdf   : > { %v428_v4 = vadd.f32 %v2723_v52, %v427_v3  ;;  %2270 = vmatprep.mubr.f32.mxu0 %v568_v0  ;;  %v571_v7 = vmax.f32 %v433_v2, 0.0 }
  0xe0   : > { %v2198_v5 = vpop.f32.mrf.mxu0  ;;  %2271 = vmatmul.mubr.f32.gmra.mxu0 %v569_v1 }
  0xe1   : > { %v570_v6 = vmax.f32 %v428_v4, 0.0  ;;  %v443_v8 = vadd.f32 %v2198_v5, %v2723_v52 }
  0xe2   : > { %v437_v9 = vpop.f32.mrf.mxu0 }
  0xe3   : > { %2273 = vmatprep.mubr.f32.mxu0 %v570_v6  ;;  %v438_v10 = vadd.f32 %v2723_v52, %v437_v9  ;;  %v573_v13 = vmax.f32 %v443_v8, 0.0 }
  0xe4   : > { %v2201_v11 = vpop.f32.mrf.mxu0  ;;  %2274 = vmatmul.mubr.f32.gmra.mxu0 %v571_v7 }
  0xe5   : > { %v572_v12 = vmax.f32 %v438_v10, 0.0  ;;  %v453_v14 = vadd.f32 %v2201_v11, %v2723_v52 }
  0xe6   : > { %v447_v15 = vpop.f32.mrf.mxu0 }
  0xe7   : > { %v448_v16 = vadd.f32 %v2723_v52, %v447_v15  ;;  %2276 = vmatprep.mubr.f32.mxu1 %v572_v12  ;;  %v575_v19 = vmax.f32 %v453_v14, 0.0 }
  0xe8   : > { %v2204_v17 = vpop.f32.mrf.mxu0  ;;  %2277 = vmatmul.mubr.f32.vlgmr.msra.gmra.mxu1 %v573_v13 }
  0xe9   : > { %v574_v18 = vmax.f32 %v448_v16, 0.0  ;;  %v463_v20 = vadd.f32 %v2204_v17, %v2723_v52 }
  0xea   : > { %v457_v21 = vpop.f32.mrf.mxu0 }
  0xeb   : > { %v458_v22 = vadd.f32 %v2723_v52, %v457_v21  ;;  %2279 = vmatprep.mubr.f32.mxu1 %v574_v18  ;;  %v577_v25 = vmax.f32 %v463_v20, 0.0 }
  0xec   : > { %v2207_v23 = vpop.f32.mrf.mxu0  ;;  %2280 = vmatmul.mubr.f32.gmra.mxu1 %v575_v19 }
  0xed   : > { %v576_v24 = vmax.f32 %v458_v22, 0.0  ;;  %v473_v26 = vadd.f32 %v2207_v23, %v2723_v52 }
  0xee   : > { %v467_v27 = vpop.f32.mrf.mxu0 }
  0xef   : > { %v468_v28 = vadd.f32 %v2723_v52, %v467_v27  ;;  %2282 = vmatprep.mubr.f32.mxu1 %v576_v24  ;;  %v579_v31 = vmax.f32 %v473_v26, 0.0 }
  0xf0   : > { %v2210_v29 = vpop.f32.mrf.mxu0  ;;  %2283 = vmatmul.mubr.f32.gmra.mxu1 %v577_v25 }
  0xf1   : > { %v578_v30 = vmax.f32 %v468_v28, 0.0  ;;  %v483_v32 = vadd.f32 %v2210_v29, %v2723_v52 }
  0xf2   : > { %v477_v33 = vpop.f32.mrf.mxu0 }
  0xf3   : > { %v478_v34 = vadd.f32 %v2723_v52, %v477_v33  ;;  %2285 = vmatprep.mubr.f32.mxu1 %v578_v30  ;;  %v581_v37 = vmax.f32 %v483_v32, 0.0 }
  0xf4   : > { %v2213_v35 = vpop.f32.mrf.mxu0  ;;  %2286 = vmatmul.mubr.f32.gmra.mxu1 %v579_v31 }
  0xf5   : > { %v580_v36 = vmax.f32 %v478_v34, 0.0  ;;  %v493_v38 = vadd.f32 %v2213_v35, %v2723_v52 }
  0xf6   : > { %v487_v39 = vpop.f32.mrf.mxu0 }
  0xf7   : > { %v488_v40 = vadd.f32 %v2723_v52, %v487_v39  ;;  %2288 = vmatprep.mubr.f32.mxu1 %v580_v36  ;;  %v583_v43 = vmax.f32 %v493_v38, 0.0 }
  0xf8   : > { %v2216_v41 = vpop.f32.mrf.mxu0  ;;  %2289 = vmatmul.mubr.f32.gmra.mxu1 %v581_v37 }
  0xf9   : > { %v582_v42 = vmax.f32 %v488_v40, 0.0  ;;  %v503_v44 = vadd.f32 %v2216_v41, %v2723_v52 }
  0xfa   : > { %v497_v45 = vpop.f32.mrf.mxu0 }
  0xfb   : > { %v498_v46 = vadd.f32 %v2723_v52, %v497_v45  ;;  %2291 = vmatprep.mubr.f32.mxu1 %v582_v42  ;;  %v585_v49 = vmax.f32 %v503_v44, 0.0 }
  0xfc   : > { %v2219_v47 = vpop.f32.mrf.mxu0  ;;  %2292 = vmatmul.mubr.f32.gmra.mxu1 %v583_v43 }
  0xfd   : > { %v584_v48 = vmax.f32 %v498_v46, 0.0  ;;  %v513_v50 = vadd.f32 %v2219_v47, %v2723_v52 }
  0xfe   : > { %v507_v51 = vpop.f32.mrf.mxu0 }
  0xff   : > { %v508_v53 = vadd.f32 %v2723_v52, %v507_v51  ;;  %2294 = vmatprep.mubr.f32.mxu1 %v584_v48  ;;  %v587_v56 = vmax.f32 %v513_v50, 0.0 }
 0x100   : > { %v2222_v54 = vpop.f32.mrf.mxu0  ;;  %2295 = vmatmul.mubr.f32.gmra.mxu1 %v585_v49 }
 0x101   : > { %v586_v55 = vmax.f32 %v508_v53, 0.0  ;;  %v523_v57 = vadd.f32 %v2222_v54, %v2723_v52 }
 0x102   : > { %v517_v58 = vpop.f32.mrf.mxu0 }
 0x103   : > { %v518_v59 = vadd.f32 %v2723_v52, %v517_v58  ;;  %2297 = vmatprep.mubr.f32.mxu1 %v586_v55  ;;  %v589_v62 = vmax.f32 %v523_v57, 0.0 }
 0x104   : > { %v2225_v60 = vpop.f32.mrf.mxu0  ;;  %2298 = vmatmul.mubr.f32.gmra.mxu1 %v587_v56 }
 0x105   : > { %v588_v61 = vmax.f32 %v518_v59, 0.0  ;;  %v533_v63 = vadd.f32 %v2225_v60, %v2723_v52  ;;  %v839_v60 = vlaneseq }
 0x106   : > { %v527_v0 = vpop.f32.mrf.mxu0 }
 0x107   : > { %v528_v1 = vadd.f32 %v2723_v52, %v527_v0  ;;  %2300 = vmatprep.mubr.f32.mxu1 %v588_v61  ;;  %v591_v4 = vmax.f32 %v533_v63, 0.0 }
 0x108   : > { %v2228_v2 = vpop.f32.mrf.mxu0  ;;  %2301 = vmatmul.mubr.f32.gmra.mxu1 %v589_v62 }
 0x109   : > { %v590_v3 = vmax.f32 %v528_v1, 0.0  ;;  %v543_v5 = vadd.f32 %v2228_v2, %v2723_v52 }
 0x10a   : > { %v537_v6 = vpop.f32.mrf.mxu0 }
 0x10b   : > { %v538_v7 = vadd.f32 %v2723_v52, %v537_v6  ;;  %2303 = vmatprep.mubr.f32.mxu1 %v590_v3  ;;  %v593_v10 = vmax.f32 %v543_v5, 0.0 }
 0x10c   : > { %v2231_v8 = vpop.f32.mrf.mxu0  ;;  %2304 = vmatmul.mubr.f32.gmra.mxu1 %v591_v4 }
 0x10d   : > { %v592_v9 = vmax.f32 %v538_v7, 0.0  ;;  %v553_v11 = vadd.f32 %v2231_v8, %v2723_v52  ;;  %v2792_v7 = vand.u32 127, %v839_v60 }
 0x10e   : > { %v547_v12 = vpop.f32.mrf.mxu0 }
 0x10f   : > { %v548_v13 = vadd.f32 %v2723_v52, %v547_v12  ;;  %2306 = vmatprep.mubr.f32.mxu1 %v592_v9  ;;  %v595_v16 = vmax.f32 %v553_v11, 0.0  ;;  %vm841_vm13 = vcmp.ge.s32.totalorder %v2792_v7, 12  ;;  %vm842_vm14 = vcmp.lt.s32.totalorder %v2792_v7, 24 }
 0x110   : > { %v2234_v14 = vpop.f32.mrf.mxu0  ;;  %2307 = vmatmul.mubr.f32.gmra.mxu1 %v593_v10 }
 0x111   : > { %v594_v15 = vmax.f32 %v548_v13, 0.0  ;;  %v563_v17 = vadd.f32 %v2234_v14, %v2723_v52 }
 0x112   : > { %v557_v18 = vpop.f32.mrf.mxu0 }
 0x113   : > { %v558_v19 = vadd.f32 %v2723_v52, %v557_v18  ;;  %2309 = vmatprep.mubr.f32.mxu1 %v594_v15  ;;  %v597_v21 = vmax.f32 %v563_v17, 0.0 }
 0x114   : > { %2310 = vmatmul.mubr.f32.gmra.mxu1 %v595_v16 }
 0x115   : > { %v596_v20 = vmax.f32 %v558_v19, 0.0 }
 0x117   : > { %2312 = vmatprep.mubr.f32.mxu1 %v596_v20 }
 0x118   : > { %2313 = vmatmul.mubr.f32.gmra.mxu1 %v597_v21 }
 0x19c   : > { %v2757_v22 = vpop.f32.mrf.mxu0 }
 0x19d   : > { %v877_v23 = vand.u32 2147483647, %v2757_v22  ;;  %v845_v8 = vmax.f32 %v2757_v22, 0.0 }
 0x19e   : > { %v2760_v24 = vpop.f32.mrf.mxu0 }
 0x19f   : > { %v909_v25 = vsub.f32 0.0, %v877_v23  ;;  %v876_v26 = vand.u32 2147483647, %v2760_v24  ;;  %v844_v10 = vmax.f32 %v2760_v24, 0.0 }
 0x1a0   : > { %v2763_v27 = vpop.f32.mrf.mxu0 }
 0x1a1   : > { %v942_v28 = vmul.f32 1.442695, %v909_v25  ;;  %v908_v29 = vsub.f32 0.0, %v876_v26  ;;  %v879_v52 = vand.u32 2147483647, %v2763_v27  ;;  %v847_v11 = vmax.f32 %v2763_v27, 0.0 }
 0x1a2   : > { %v2766_v30 = vpop.f32.mrf.mxu0 }
 0x1a3   : > { %2355 = vpow2.f32 %v942_v28  ;;  %v940_v31 = vmul.f32 1.442695, %v908_v29  ;;  %v911_v32 = vsub.f32 0.0, %v879_v52  ;;  %v878_v33 = vand.u32 2147483647, %v2766_v30 }
 0x1a4   : > { %v2769_v34 = vpop.f32.mrf.mxu0  ;;  %v846_v12 = vmax.f32 %v2766_v30, 0.0 }
 0x1a5   : > { %2357 = vpow2.f32 %v940_v31  ;;  %v946_v35 = vmul.f32 1.442695, %v911_v32  ;;  %v881_v36 = vand.u32 2147483647, %v2769_v34  ;;  %v910_v37 = vsub.f32 0.0, %v878_v33 }
 0x1a6   : > { %v2772_v38 = vpop.f32.mrf.mxu0  ;;  %v849_v15 = vmax.f32 %v2769_v34, 0.0 }
 0x1a7   : > { %2359 = vpow2.f32 %v946_v35  ;;  %v913_v39 = vsub.f32 0.0, %v881_v36  ;;  %v880_v40 = vand.u32 2147483647, %v2772_v38  ;;  %v944_v41 = vmul.f32 1.442695, %v910_v37 }
 0x1a8   : > { %v2775_v42 = vpop.f32.mrf.mxu1  ;;  %v848_v16 = vmax.f32 %v2772_v38, 0.0 }
 0x1a9   : > { %v950_v43 = vmul.f32 1.442695, %v913_v39  ;;  %v912_v44 = vsub.f32 0.0, %v880_v40  ;;  %v883_v45 = vand.u32 2147483647, %v2775_v42  ;;  %2361 = vpow2.f32 %v944_v41 }
 0x1aa   : > { %v2778_v46 = vpop.f32.mrf.mxu1  ;;  %v851_v26 = vmax.f32 %v2775_v42, 0.0 }
 0x1ab   : > { %2363 = vpow2.f32 %v950_v43  ;;  %v948_v47 = vmul.f32 1.442695, %v912_v44  ;;  %v915_v48 = vsub.f32 0.0, %v883_v45  ;;  %v882_v49 = vand.u32 2147483647, %v2778_v46 }
 0x1ac   : > { %v2781_v50 = vpop.f32.mrf.mxu1  ;;  %v850_v28 = vmax.f32 %v2778_v46, 0.0 }
 0x1ad   : > { %2365 = vpow2.f32 %v948_v47  ;;  %v954_v51 = vmul.f32 1.442695, %v915_v48  ;;  %v885_v53 = vand.u32 2147483647, %v2781_v50  ;;  %v914_v54 = vsub.f32 0.0, %v882_v49 }
 0x1ae   : > { %v2784_v55 = vpop.f32.mrf.mxu1  ;;  %v853_v32 = vmax.f32 %v2781_v50, 0.0 }
 0x1af   : > { %2367 = vpow2.f32 %v954_v51  ;;  %v917_v56 = vsub.f32 0.0, %v885_v53  ;;  %v884_v57 = vand.u32 2147483647, %v2784_v55  ;;  %v952_v59 = vmul.f32 1.442695, %v914_v54 }
 0x1b0   : > { %v2356_v58 = vpop.eup %2355  ;;  %v2787_v63 = vpop.f32.mrf.mxu1  ;;  %v852_v35 = vmax.f32 %v2784_v55, 0.0 }
 0x1b1   : > { %v1013_v61 = vadd.f32 1.0, %v2356_v58  ;;  %v958_v62 = vmul.f32 1.442695, %v917_v56  ;;  %2369 = vpow2.f32 %v952_v59  ;;  %v916_v1 = vsub.f32 0.0, %v884_v57 }
 0x1b2   : > { %v2358_v0 = vpop.eup %2357  ;;  %v1016_v4 = vmul.f32 -0.5, %v2356_v58  ;;  %v887_v6 = vand.u32 2147483647, %v2787_v63  ;;  %v1019_v14 = vand.u32 2147483647, %v2356_v58  ;;  %v855_v36 = vmax.f32 %v2787_v63, 0.0  ;;  %v2813_v37 = vpop.f32.mrf.mxu1 }
 0x1b3   : > { %2371 = vlog2.f32 %v1013_v61  ;;  %v1004_v2 = vadd.f32 1.0, %v2358_v0  ;;  %v956_v5 = vmul.f32 1.442695, %v916_v1  ;;  %v1007_v19 = vmul.f32 -0.5, %v2358_v0 }
 0x1b4   : > { %v2789_v3 = vpop.eup %2359  ;;  %2373 = vpow2.f32 %v958_v62  ;;  %v1017_v18 = vadd.f32 1.0, %v1016_v4  ;;  %v919_v21 = vsub.f32 0.0, %v887_v6  ;;  %v1010_v52 = vand.u32 2147483647, %v2358_v0 }
 0x1b5   : > { %2375 = vlog2.f32 %v1004_v2  ;;  %v1031_v9 = vadd.f32 1.0, %v2789_v3  ;;  %v1034_v23 = vmul.f32 -0.5, %v2789_v3  ;;  %vm2817_vm1 = vcmp.lt.f32.partialorder %v1019_v14, 0.0004427343 }
 0x1b6   : > { %2377 = vpow2.f32 %v956_v5  ;;  %v2362_v13 = vpop.eup %2361  ;;  %v1018_v40 = vmul.f32 %v2356_v58, %v1017_v18  ;;  %v1008_v43 = vadd.f32 1.0, %v1007_v19  ;;  %v962_v44 = vmul.f32 1.442695, %v919_v21 }
 0x1b7   : > { %2379 = vlog2.f32 %v1031_v9  ;;  %v1022_v20 = vadd.f32 1.0, %v2362_v13  ;;  %v1025_v31 = vmul.f32 -0.5, %v2362_v13  ;;  %v1035_v45 = vadd.f32 1.0, %v1034_v23 }
 0x1b8   : > { %v2801_v17 = vpop.eup %2363  ;;  %v1037_v47 = vand.u32 2147483647, %v2789_v3  ;;  %vm2823_vm2 = vcmp.lt.f32.partialorder %v1010_v52, 0.0004427343  ;;  %v854_v54 = vmax.f32 %v2813_v37, 0.0  ;;  %v1009_v61 = vmul.f32 %v2358_v0, %v1008_v43 }
 0x1b9   : > { %v1049_v25 = vadd.f32 1.0, %v2801_v17  ;;  %2381 = vlog2.f32 %v1022_v20  ;;  %v1026_v51 = vadd.f32 1.0, %v1025_v31  ;;  %v1052_v53 = vmul.f32 -0.5, %v2801_v17 }
 0x1ba   : > { %v2807_v29 = vpop.eup %2365  ;;  %v1028_v57 = vand.u32 2147483647, %v2362_v13  ;;  %v1055_v58 = vand.u32 2147483647, %v2801_v17  ;;  %v886_v59 = vand.u32 2147483647, %v2813_v37  ;;  %v1036_v5 = vmul.f32 %v2789_v3, %v1035_v45 }
 0x1bb   : > { %2383 = vlog2.f32 %v1049_v25  ;;  %v1040_v33 = vadd.f32 1.0, %v2807_v29  ;;  %v1043_v62 = vmul.f32 -0.5, %v2807_v29  ;;  %vm2838_vm3 = vcmp.lt.f32.partialorder %v1037_v47, 0.0004427343 }
 0x1bc   : > { %v2815_v39 = vpop.eup %2367  ;;  %v1027_v18 = vmul.f32 %v2362_v13, %v1026_v51  ;;  %v1053_v19 = vadd.f32 1.0, %v1052_v53  ;;  %vm2848_vm4 = vcmp.lt.f32.partialorder %v1028_v57, 0.0004427343  ;;  %vm2852_vm5 = vcmp.lt.f32.partialorder %v1055_v58, 0.0004427343 }
 0x1bd   : > { %2385 = vlog2.f32 %v1040_v33  ;;  %v1067_v48 = vadd.f32 1.0, %v2815_v39  ;;  %v1070_v9 = vmul.f32 -0.5, %v2815_v39  ;;  %v1046_v13 = vand.u32 2147483647, %v2807_v29 }
 0x1be   : > { %v2829_v56 = vpop.eup %2369  ;;  %v918_v52 = vsub.f32 0.0, %v886_v59  ;;  %v1044_v43 = vadd.f32 1.0, %v1043_v62  ;;  %v1073_v41 = vand.u32 2147483647, %v2815_v39 }
 0x1bf   : > { %2387 = vlog2.f32 %v1067_v48  ;;  %v1058_v1 = vadd.f32 1.0, %v2829_v56  ;;  %v1071_v45 = vadd.f32 1.0, %v1070_v9  ;;  %v1061_v53 = vmul.f32 -0.5, %v2829_v56 }
 0x1c0   : > { %v2372_v60 = vpop.eup %2371  ;;  %2389 = vpow2.f32 %v962_v44  ;;  %v960_v59 = vmul.f32 1.442695, %v918_v52  ;;  %v1045_v62 = vmul.f32 %v2807_v29, %v1044_v43  ;;  %vm2875_vm6 = vcmp.lt.f32.partialorder %v1046_v13, 0.0004427343 }
 0x1c1   : > { %v2835_v2 = vpop.eup %2373  ;;  %v1015_v4 = vmul.f32 0.6931472, %v2372_v60  ;;  %2391 = vlog2.f32 %v1058_v1  ;;  %vm2883_vm7 = vcmp.lt.f32.partialorder %v1073_v41, 0.0004427343  ;;  %v1072_v29 = vmul.f32 %v2815_v39, %v1071_v45 }
 0x1c2   : > { %v2376_v14 = vpop.eup %2375  ;;  %v1085_v0 = vadd.f32 1.0, %v2835_v2  ;;  %v1088_v49 = vmul.f32 -0.5, %v2835_v2 }
 0x1c3   : > { %v2844_v20 = vpop.eup %2377  ;;  %v1021_v21 = vsel %vm2817_vm1, %v1018_v40, %v1015_v4  ;;  %v1006_v23 = vmul.f32 0.6931472, %v2376_v14 }
 0x1c4   : > { %v2380_v31 = vpop.eup %2379  ;;  %v1293_v33 = vadd.f32 %v1021_v21, %v845_v8  ;;  %2393 = vlog2.f32 %v1085_v0  ;;  %v1076_v47 = vadd.f32 1.0, %v2844_v20  ;;  %v1064_v8 = vand.u32 2147483647, %v2829_v56 }
 0x1c5   : > { %v1012_v40 = vsel %vm2823_vm2, %v1009_v61, %v1006_v23  ;;  %v1033_v44 = vmul.f32 0.6931472, %v2380_v31  ;;  %v1054_v61 = vmul.f32 %v2801_v17, %v1053_v19  ;;  %v1062_v0 = vadd.f32 1.0, %v1061_v53 }
 0x1c6   : > { %v2863_v48 = vadd.f32 1e-08, %v1293_v33  ;;  %v1292_v51 = vadd.f32 %v1012_v40, %v844_v10  ;;  %v2382_v57 = vpop.eup %2381  ;;  %2395 = vlog2.f32 %v1076_v47  ;;  %v1091_v17 = vand.u32 2147483647, %v2835_v2 }
 0x1c7   : > { %v1039_v58 = vsel %vm2838_vm3, %v1036_v5, %v1033_v44  ;;  %v1024_v5 = vmul.f32 0.6931472, %v2382_v57  ;;  %vm2890_vm8 = vcmp.lt.f32.partialorder %v1064_v8, 0.0004427343  ;;  %v1079_v40 = vmul.f32 -0.5, %v2844_v20 }
 0x1c8   : > { %v2384_v60 = vpop.eup %2383  ;;  %2397 = vrsqrt.f32 %v2863_v48  ;;  %v2879_v1 = vadd.f32 1e-08, %v1292_v51  ;;  %v1295_v4 = vadd.f32 %v1039_v58, %v847_v11  ;;  %v1089_v11 = vadd.f32 1.0, %v1088_v49 }
 0x1c9   : > { %v1051_v6 = vmul.f32 0.6931472, %v2384_v60  ;;  %2399 = vpow2.f32 %v960_v59  ;;  %v1030_v13 = vsel %vm2848_vm4, %v1027_v18, %v1024_v5  ;;  %v1063_v3 = vmul.f32 %v2829_v56, %v1062_v0  ;;  %v2930_v59 = vpop.f32.mrf.mxu1 }
 0x1ca   : > { %v2386_v9 = vpop.eup %2385  ;;  %2401 = vrsqrt.f32 %v2879_v1  ;;  %v2894_v23 = vadd.f32 1e-08, %v1295_v4  ;;  %v1294_v39 = vadd.f32 %v1030_v13, %v846_v12  ;;  %vm2909_vm9 = vcmp.lt.f32.partialorder %v1091_v17, 0.0004427343 }
 0x1cb   : > { %v1057_v52 = vsel %vm2852_vm5, %v1054_v61, %v1051_v6  ;;  %v1042_v31 = vmul.f32 0.6931472, %v2386_v9  ;;  %v1082_v25 = vand.u32 2147483647, %v2844_v20  ;;  %vm1365_vm10 = vcmp.eq.f32.partialorder %v2863_v48, inf }
 0x1cc   : > { %v2388_v21 = vpop.eup %2387  ;;  %v1297_v43 = vadd.f32 %v1057_v52, %v849_v15  ;;  %2403 = vrsqrt.f32 %v2894_v23  ;;  %v2914_v45 = vadd.f32 1e-08, %v1294_v39  ;;  %v1090_v58 = vmul.f32 %v2835_v2, %v1089_v11 }
 0x1cd   : > { %v2900_v33 = vpop.eup %2389  ;;  %v1069_v41 = vmul.f32 0.6931472, %v2388_v21  ;;  %v1048_v15 = vsel %vm2875_vm6, %v1045_v62, %v1042_v31  ;;  %v1080_v49 = vadd.f32 1.0, %v1079_v40  ;;  %vm1367_vm11 = vcmp.eq.f32.partialorder %v2863_v48, 0.0 }
 0x1ce   : > { %v2392_v44 = vpop.eup %2391  ;;  %v2916_v12 = vadd.f32 1e-08, %v1297_v43  ;;  %v1296_v56 = vadd.f32 %v1048_v15, %v848_v16  ;;  %v1103_v8 = vadd.f32 1.0, %v2900_v33  ;;  %2405 = vrsqrt.f32 %v2914_v45 }
 0x1cf   : > { %v1075_v47 = vsel %vm2883_vm7, %v1072_v29, %v1069_v41  ;;  %v1060_v53 = vmul.f32 0.6931472, %v2392_v44  ;;  %v1368_v16 = vand.u32 2147483648, %v2863_v48  ;;  %vm2935_vm12 = vcmp.lt.f32.partialorder %v1082_v25, 0.0004427343  ;;  %v2980_v41 = vpop.f32.mrf.mxu1 }
 0x1d0   : > { %v1299_v51 = vadd.f32 %v1075_v47, %v851_v26  ;;  %2407 = vrsqrt.f32 %v2916_v12  ;;  %v2941_v60 = vadd.f32 1e-08, %v1296_v56  ;;  %vm1358_vm15 = vcmp.eq.f32.partialorder %v2879_v1, inf }
 0x1d1   : > { %v2394_v57 = vpop.eup %2393  ;;  %v1066_v61 = vsel %vm2890_vm8, %v1063_v3, %v1060_v53  ;;  %2409 = vlog2.f32 %v1103_v8  ;;  %v889_v5 = vand.u32 2147483647, %v2930_v59  ;;  %vm1360_vm0 = vcmp.eq.f32.partialorder %v2879_v1, 0.0 }
 0x1d2   : > { %v2943_v2 = vadd.f32 1e-08, %v1299_v51  ;;  %v1087_v62 = vmul.f32 0.6931472, %v2394_v57  ;;  %v1298_v4 = vadd.f32 %v1066_v61, %v850_v28  ;;  %v1361_v9 = vand.u32 2147483648, %v2879_v1 }
 0x1d3   : > { %v2396_v10 = vpop.eup %2395  ;;  %2411 = vrsqrt.f32 %v2941_v60  ;;  %v1081_v14 = vmul.f32 %v2844_v20, %v1080_v49  ;;  %vm1379_vm1 = vcmp.eq.f32.partialorder %v2894_v23, inf  ;;  %vm1381_vm2 = vcmp.eq.f32.partialorder %v2894_v23, 0.0 }
 0x1d4   : > { %2413 = vrsqrt.f32 %v2943_v2  ;;  %v1382_v17 = vand.u32 2147483648, %v2894_v23  ;;  %v2962_v29 = vadd.f32 1e-08, %v1298_v4  ;;  %v1093_v19 = vsel %vm2909_vm9, %v1090_v58, %v1087_v62  ;;  %v3001_v58 = vpop.f32.mrf.mxu1 }
 0x1d5   : > { %v2398_v6 = vpop.eup %2397  ;;  %v1078_v11 = vmul.f32 0.6931472, %v2396_v10  ;;  %vm1372_vm3 = vcmp.eq.f32.partialorder %v2914_v45, inf  ;;  %v1375_v13 = vand.u32 2147483648, %v2914_v45  ;;  %v1301_v52 = vadd.f32 %v1093_v19, %v853_v32 }
 0x1d6   : > { %v1364_v0 = vmul.f32 %v2398_v6, %v2863_v48  ;;  %v2959_v28 = vpop.eup %2399  ;;  %vm1374_vm4 = vcmp.eq.f32.partialorder %v2914_v45, 0.0  ;;  %vm1393_vm5 = vcmp.eq.f32.partialorder %v2916_v12, inf  ;;  %2415 = vrsqrt.f32 %v2962_v29 }
 0x1d7   : > { %v2402_v21 = vpop.eup %2401  ;;  %v1106_v43 = vmul.f32 -0.5, %v2900_v33  ;;  %vm1395_vm6 = vcmp.eq.f32.partialorder %v2916_v12, 0.0  ;;  %v1396_v32 = vand.u32 2147483648, %v2916_v12  ;;  %v2984_v3 = vadd.f32 1e-08, %v1301_v52 }
 0x1d8   : > { %v1366_v20 = vsel %vm1365_vm10, %v2863_v48, %v1364_v0  ;;  %v1357_v39 = vmul.f32 %v2402_v21, %v2879_v1  ;;  %v1084_v25 = vsel %vm2935_vm12, %v1081_v14, %v1078_v11  ;;  %v1109_v44 = vand.u32 2147483647, %v2900_v33  ;;  %vm3007_vm10 = vmand %vm841_vm13, %vm842_vm14 }
 0x1d9   : > { %v1369_v31 = vsel %vm1367_vm11, %v1368_v16, %v1366_v20  ;;  %v2404_v48 = vpop.eup %2403  ;;  %v1094_v15 = vadd.f32 1.0, %v2959_v28  ;;  %vm1386_vm7 = vcmp.eq.f32.partialorder %v2941_v60, inf  ;;  %v1389_v51 = vand.u32 2147483648, %v2941_v60  ;;  %v3047_v20 = vpop.f32.mrf.mxu1 }
 0x1da   : > { %v1581_v40 = vmax.f32 %v1369_v31, 1e-05  ;;  %v1359_v18 = vsel %vm1358_vm15, %v2879_v1, %v1357_v39  ;;  %v1378_v56 = vmul.f32 %v2404_v48, %v2894_v23  ;;  %2417 = vrsqrt.f32 %v2984_v3 }
 0x1db   : > { %v1362_v47 = vsel %vm1360_vm0, %v1361_v9, %v1359_v18  ;;  %vm1388_vm8 = vcmp.eq.f32.partialorder %v2941_v60, 0.0  ;;  %vm1407_vm9 = vcmp.eq.f32.partialorder %v2943_v2, inf  ;;  %v1107_v57 = vadd.f32 1.0, %v1106_v43  ;;  %v2406_v49 = vpop.eup %2405 }
 0x1dc   : > { %v1613_v53 = vmin.f32 %v1581_v40, 100000.0  ;;  %v1580_v8 = vmax.f32 %v1362_v47, 1e-05  ;;  %v1380_v16 = vsel %vm1379_vm1, %v2894_v23, %v1378_v56  ;;  %vm1409_vm11 = vcmp.eq.f32.partialorder %v2943_v2, 0.0  ;;  %v3072_v47 = vpop.f32.mrf.mxu1 }
 0x1dd   : > { %v1410_v26 = vand.u32 2147483648, %v2943_v2  ;;  %v1300_v61 = vadd.f32 %v1084_v25, %v852_v35  ;;  %2419 = vlog2.f32 %v1094_v15  ;;  %v2408_v62 = vpop.eup %2407  ;;  %v1383_v7 = vsel %vm1381_vm2, %v1382_v17, %v1380_v16 }
 0x1de   : > { %v1612_v10 = vmin.f32 %v1580_v8, 100000.0  ;;  %v1371_v4 = vmul.f32 %v2406_v49, %v2914_v45  ;;  %vm3022_vm12 = vcmp.lt.f32.partialorder %v1109_v44, 0.0004427343  ;;  %v1583_v9 = vmax.f32 %v1383_v7, 1e-05  ;;  %v2410_v19 = vpop.eup %2409 }
 0x1df   : > { %v1392_v14 = vmul.f32 %v2408_v62, %v2916_v12  ;;  %vm1400_vm13 = vcmp.eq.f32.partialorder %v2962_v29, inf  ;;  %v1403_v0 = vand.u32 2147483648, %v2962_v29  ;;  %v3029_v35 = vadd.f32 1e-08, %v1300_v61 }
 0x1e0   : > { %v1645_v23 = vsel %vm3007_vm10, %v1613_v53, %v2757_v22  ;;  %v1644_v17 = vsel %vm3007_vm10, %v1612_v10, %v2760_v24  ;;  %v1373_v11 = vsel %vm1372_vm3, %v2914_v45, %v1371_v4  ;;  %vm1402_vm14 = vcmp.eq.f32.partialorder %v2962_v29, 0.0  ;;  %v2412_v22 = vpop.eup %2411 }
 0x1e1   : > { %v1108_v21 = vmul.f32 %v2900_v33, %v1107_v57  ;;  %v2003_v52 = vpack.c.bf16 %v1645_v23, %v1644_v17  ;;  %v1615_v31 = vmin.f32 %v1583_v9, 100000.0  ;;  %v1376_v39 = vsel %vm1374_vm4, %v1375_v13, %v1373_v11  ;;  %v2414_v43 = vpop.eup %2413 }
 0x1e2   : > { %v1394_v24 = vsel %vm1393_vm5, %v2916_v12, %v1392_v14  ;;  %v1582_v40 = vmax.f32 %v1376_v39, 1e-05  ;;  %v1385_v18 = vmul.f32 %v2412_v22, %v2941_v60  ;;  %vm1421_vm15 = vcmp.eq.f32.partialorder %v2984_v3, inf }
 0x1e3   : > { %v1397_v48 = vsel %vm1395_vm6, %v1396_v32, %v1394_v24  ;;  %2421 = vrsqrt.f32 %v3029_v35  ;;  %2004 = vst [vmem:[%s3037_s17] sm:$0xff] %v2003_v52   ;;  %v1406_v45 = vmul.f32 %v2414_v43, %v2943_v2  ;;  %vm1423_vm0 = vcmp.eq.f32.partialorder %v2984_v3, 0.0  ;;  %v2416_v56 = vpop.eup %2415 }
 0x1e4   : > { %v1585_v33 = vmax.f32 %v1397_v48, 1e-05  ;;  %v1424_v13 = vand.u32 2147483648, %v2984_v3  ;;  %v1097_v25 = vmul.f32 -0.5, %v2959_v28  ;;  %v1647_v12 = vsel %vm3007_vm10, %v1615_v31, %v2763_v27 }
 0x1e5   : > { %v1614_v32 = vmin.f32 %v1582_v40, 100000.0  ;;  %v1387_v44 = vsel %vm1386_vm7, %v2941_v60, %v1385_v18  ;;  %v921_v15 = vsub.f32 0.0, %v889_v5  ;;  %v1408_v57 = vsel %vm1407_vm9, %v2943_v2, %v1406_v45 }
 0x1e6   : > { %v1617_v53 = vmin.f32 %v1585_v33, 100000.0  ;;  %v1390_v8 = vsel %vm1388_vm8, %v1389_v51, %v1387_v44  ;;  %v1105_v27 = vmul.f32 0.6931472, %v2410_v19  ;;  %v1411_v5 = vsel %vm1409_vm11, %v1410_v26, %v1408_v57  ;;  %v3093_v26 = vpop.f32.mrf.mxu1 }
 0x1e7   : > { %v1646_v49 = vsel %vm3007_vm10, %v1614_v32, %v2766_v30  ;;  %v1584_v16 = vmax.f32 %v1390_v8, 1e-05  ;;  %v1399_v61 = vmul.f32 %v2416_v56, %v2962_v29  ;;  %v1587_v10 = vmax.f32 %v1411_v5, 1e-05  ;;  %v2418_v7 = vpop.eup %2417 }
 0x1e8   : > { %v2008_v62 = vpack.c.bf16 %v1647_v12, %v1646_v49  ;;  %v1111_v60 = vsel %vm3022_vm12, %v1108_v21, %v1105_v27  ;;  %v1098_v51 = vadd.f32 1.0, %v1097_v25  ;;  %v1100_v2 = vand.u32 2147483647, %v2959_v28 }
 0x1e9   : > { %v1616_v4 = vmin.f32 %v1584_v16, 100000.0  ;;  %v1401_v9 = vsel %vm1400_vm13, %v2962_v29, %v1399_v61  ;;  %v1303_v30 = vadd.f32 %v1111_v60, %v855_v36  ;;  %v1649_v6 = vsel %vm3007_vm10, %v1617_v53, %v2769_v34 }
 0x1ea   : > { %2080 = vst [vmem:[%s3037_s17 + $0x8] sm:$0xff] %v2008_v62   ;;  %v1619_v14 = vmin.f32 %v1587_v10, 100000.0  ;;  %v1404_v19 = vsel %vm1402_vm14, %v1403_v0, %v1401_v9  ;;  %v1420_v23 = vmul.f32 %v2418_v7, %v2984_v3  ;;  %v2420_v17 = vpop.eup %2419  ;;  %v966_v22 = vmul.f32 1.442695, %v921_v15 }
 0x1eb   : > { %v1648_v36 = vsel %vm3007_vm10, %v1616_v4, %v2772_v38  ;;  %v1586_v11 = vmax.f32 %v1404_v19, 1e-05  ;;  %v3105_v21 = vadd.f32 1e-08, %v1303_v30  ;;  %v1096_v31 = vmul.f32 0.6931472, %v2420_v17  ;;  %v3114_v38 = vpop.f32.mrf.mxu1 }
 0x1ec   : > { %v2013_v52 = vpack.c.bf16 %v1649_v6, %v1648_v36  ;;  %v1422_v34 = vsel %vm1421_vm15, %v2984_v3, %v1420_v23  ;;  %v1099_v29 = vmul.f32 %v2959_v28, %v1098_v51  ;;  %vm1101_vm1 = vcmp.lt.f32.partialorder %v1100_v2, 0.0004427343 }
 0x1ed   : > { %v1618_v0 = vmin.f32 %v1586_v11, 100000.0  ;;  %v1425_v39 = vsel %vm1423_vm0, %v1424_v13, %v1422_v34  ;;  %2423 = vrsqrt.f32 %v3105_v21  ;;  %v1651_v43 = vsel %vm3007_vm10, %v1619_v14, %v2775_v42  ;;  %v3130_v42 = vpop.f32.mrf.mxu1 }
 0x1ee   : > { %2081 = vst [vmem:[%s3037_s17 + $0x10] sm:$0xff] %v2013_v52   ;;  %v1102_v24 = vsel %vm1101_vm1, %v1099_v29, %v1096_v31  ;;  %2425 = vpow2.f32 %v966_v22  ;;  %v1589_v18 = vmax.f32 %v1425_v39, 1e-05  ;;  %v888_v33 = vand.u32 2147483647, %v2980_v41 }
 0x1ef   : > { %v1650_v28 = vsel %vm3007_vm10, %v1618_v0, %v2778_v46  ;;  %v1302_v3 = vadd.f32 %v1102_v24, %v854_v54  ;;  %v891_v25 = vand.u32 2147483647, %v3001_v58  ;;  %vm1414_vm2 = vcmp.eq.f32.partialorder %v3029_v35, inf  ;;  %v3140_v49 = vpop.f32.mrf.mxu1 }
 0x1f0   : > { %v2422_v40 = vpop.eup %2421  ;;  %v2018_v48 = vpack.c.bf16 %v1651_v43, %v1650_v28  ;;  %v1417_v46 = vand.u32 2147483648, %v3029_v35  ;;  %v920_v54 = vsub.f32 0.0, %v888_v33  ;;  %v890_v12 = vand.u32 2147483647, %v3047_v20 }
 0x1f1   : > { %v1413_v45 = vmul.f32 %v2422_v40, %v3029_v35  ;;  %v3127_v13 = vadd.f32 1e-08, %v1302_v3  ;;  %vm1416_vm3 = vcmp.eq.f32.partialorder %v3029_v35, 0.0  ;;  %v1621_v44 = vmin.f32 %v1589_v18, 100000.0  ;;  %v3151_v2 = vpop.f32.mrf.mxu1 }
 0x1f2   : > { %2082 = vst [vmem:[%s3037_s17 + $0x18] sm:$0xff] %v2018_v48   ;;  %v964_v56 = vmul.f32 1.442695, %v920_v54  ;;  %v923_v53 = vsub.f32 0.0, %v891_v25  ;;  %v922_v57 = vsub.f32 0.0, %v890_v12  ;;  %vm1435_vm4 = vcmp.eq.f32.partialorder %v3105_v21, inf }
 0x1f3   : > { %v1415_v32 = vsel %vm1414_vm2, %v3029_v35, %v1413_v45  ;;  %2427 = vrsqrt.f32 %v3127_v13  ;;  %v893_v27 = vand.u32 2147483647, %v3072_v47  ;;  %v892_v5 = vand.u32 2147483647, %v3093_v26  ;;  %v3168_v33 = vpop.f32.mrf.mxu1 }
 0x1f4   : > { %v1418_v15 = vsel %vm1416_vm3, %v1417_v46, %v1415_v32  ;;  %2429 = vpow2.f32 %v964_v56  ;;  %v970_v16 = vmul.f32 1.442695, %v923_v53  ;;  %v968_v62 = vmul.f32 1.442695, %v922_v57 }
 0x1f5   : > { %v1588_v8 = vmax.f32 %v1418_v15, 1e-05  ;;  %v925_v10 = vsub.f32 0.0, %v893_v27  ;;  %v895_v35 = vand.u32 2147483647, %v3114_v38  ;;  %v1653_v60 = vsel %vm3007_vm10, %v1621_v44, %v2781_v50 }
 0x1f6   : > { %2431 = vpow2.f32 %v970_v16  ;;  %v924_v51 = vsub.f32 0.0, %v892_v5  ;;  %v894_v7 = vand.u32 2147483647, %v3130_v42  ;;  %v897_v36 = vand.u32 2147483647, %v3140_v49 }
 0x1f7   : > { %v1620_v61 = vmin.f32 %v1588_v8, 100000.0  ;;  %2433 = vpow2.f32 %v968_v62  ;;  %v974_v9 = vmul.f32 1.442695, %v925_v10  ;;  %v927_v30 = vsub.f32 0.0, %v895_v35 }
 0x1f8   : > { %v972_v19 = vmul.f32 1.442695, %v924_v51  ;;  %v926_v50 = vsub.f32 0.0, %v894_v7  ;;  %v896_v52 = vand.u32 2147483647, %v3151_v2  ;;  %vm1437_vm5 = vcmp.eq.f32.partialorder %v3105_v21, 0.0  ;;  %v3192_v7 = vpop.f32.mrf.mxu1 }
 0x1f9   : > { %v1652_v4 = vsel %vm3007_vm10, %v1620_v61, %v2784_v55  ;;  %2435 = vpow2.f32 %v974_v9  ;;  %v978_v17 = vmul.f32 1.442695, %v927_v30  ;;  %v1438_v55 = vand.u32 2147483648, %v3105_v21 }
 0x1fa   : > { %v2424_v6 = vpop.eup %2423  ;;  %v2023_v14 = vpack.c.bf16 %v1653_v60, %v1652_v4  ;;  %2437 = vpow2.f32 %v972_v19  ;;  %v976_v22 = vmul.f32 1.442695, %v926_v50  ;;  %v929_v0 = vsub.f32 0.0, %v897_v36 }
 0x1fb   : > { %v1434_v23 = vmul.f32 %v2424_v6, %v3105_v21  ;;  %v3156_v11 = vpop.eup %2425  ;;  %2439 = vpow2.f32 %v978_v17  ;;  %v928_v39 = vsub.f32 0.0, %v896_v52  ;;  %v857_v43 = vmax.f32 %v2930_v59, 0.0 }
 0x1fc   : > { %2083 = vst [vmem:[%s3037_s17 + $0x20] sm:$0xff] %v2023_v14   ;;  %v1121_v31 = vadd.f32 1.0, %v3156_v11  ;;  %v982_v28 = vmul.f32 1.442695, %v929_v0  ;;  %v856_v18 = vmax.f32 %v2980_v41, 0.0  ;;  %vm1428_vm6 = vcmp.eq.f32.partialorder %v3127_v13, inf }
 0x1fd   : > { %v1436_v34 = vsel %vm1435_vm4, %v3105_v21, %v1434_v23  ;;  %v980_v3 = vmul.f32 1.442695, %v928_v39  ;;  %v859_v21 = vmax.f32 %v3001_v58, 0.0  ;;  %v1431_v45 = vand.u32 2147483648, %v3127_v13 }
 0x1fe   : > { %v1439_v29 = vsel %vm1437_vm5, %v1438_v55, %v1436_v34  ;;  %2441 = vlog2.f32 %v1121_v31  ;;  %v858_v25 = vmax.f32 %v3047_v20, 0.0  ;;  %vm1430_vm7 = vcmp.eq.f32.partialorder %v3127_v13, 0.0 }
 0x1ff   : > { %2443 = vpow2.f32 %v976_v22  ;;  %v1591_v40 = vmax.f32 %v1439_v29, 1e-05  ;;  %v1124_v12 = vmul.f32 -0.5, %v3156_v11  ;;  %v861_v15 = vmax.f32 %v3072_v47, 0.0 }
 0x200   : > { %v2428_v24 = vpop.eup %2427  ;;  %2445 = vpow2.f32 %v982_v28  ;;  %v899_v56 = vand.u32 2147483647, %v3168_v33  ;;  %v1127_v27 = vand.u32 2147483647, %v3156_v11  ;;  %v860_v16 = vmax.f32 %v3093_v26, 0.0 }
 0x201   : > { %v1427_v48 = vmul.f32 %v2428_v24, %v3127_v13  ;;  %v3173_v46 = vpop.eup %2429  ;;  %2447 = vpow2.f32 %v980_v3  ;;  %v1623_v8 = vmin.f32 %v1591_v40, 100000.0  ;;  %v863_v61 = vmax.f32 %v3114_v38, 0.0 }
 0x202   : > { %v1112_v44 = vadd.f32 1.0, %v3173_v46  ;;  %v862_v62 = vmax.f32 %v3130_v42, 0.0  ;;  %v1125_v35 = vadd.f32 1.0, %v1124_v12  ;;  %v865_v51 = vmax.f32 %v3140_v49, 0.0 }
 0x203   : > { %v1429_v54 = vsel %vm1428_vm6, %v3127_v13, %v1427_v48  ;;  %v3181_v53 = vpop.eup %2431  ;;  %v1115_v9 = vmul.f32 -0.5, %v3173_v46  ;;  %v864_v30 = vmax.f32 %v3151_v2, 0.0  ;;  %v931_v6 = vsub.f32 0.0, %v899_v56 }
 0x204   : > { %v1432_v32 = vsel %vm1430_vm7, %v1431_v45, %v1429_v54  ;;  %v3185_v5 = vpop.eup %2433  ;;  %2449 = vlog2.f32 %v1112_v44  ;;  %v1139_v13 = vadd.f32 1.0, %v3181_v53  ;;  %v1655_v19 = vsel %vm3007_vm10, %v1623_v8, %v2787_v63 }
 0x205   : > { %v1590_v57 = vmax.f32 %v1432_v32, 1e-05  ;;  %v1130_v60 = vadd.f32 1.0, %v3185_v5  ;;  %vm3206_vm8 = vcmp.lt.f32.partialorder %v1127_v27, 0.0004427343  ;;  %v1126_v63 = vmul.f32 %v3156_v11, %v1125_v35 }
 0x206   : > { %v3194_v4 = vpop.eup %2435  ;;  %2451 = vlog2.f32 %v1139_v13  ;;  %v1118_v36 = vand.u32 2147483647, %v3173_v46  ;;  %v898_v22 = vand.u32 2147483647, %v3192_v7  ;;  %v1142_v34 = vmul.f32 -0.5, %v3181_v53 }
 0x207   : > { %v1622_v10 = vmin.f32 %v1590_v57, 100000.0  ;;  %v3198_v14 = vpop.eup %2437  ;;  %2453 = vlog2.f32 %v1130_v60  ;;  %v1157_v55 = vadd.f32 1.0, %v3194_v4  ;;  %v867_v31 = vmax.f32 %v3168_v33, 0.0 }
 0x208   : > { %v3213_v52 = vpop.eup %2439  ;;  %v1116_v0 = vadd.f32 1.0, %v1115_v9  ;;  %v1133_v39 = vmul.f32 -0.5, %v3185_v5  ;;  %v986_v24 = vmul.f32 1.442695, %v931_v6  ;;  %v1145_v40 = vand.u32 2147483647, %v3181_v53 }
 0x209   : > { %v1654_v50 = vsel %vm3007_vm10, %v1622_v10, %v2813_v37  ;;  %v1148_v37 = vadd.f32 1.0, %v3198_v14  ;;  %2455 = vlog2.f32 %v1157_v55  ;;  %v1136_v11 = vand.u32 2147483647, %v3185_v5 }
 0x20a   : > { %v2028_v17 = vpack.c.bf16 %v1655_v19, %v1654_v50  ;;  %vm3225_vm9 = vcmp.lt.f32.partialorder %v1118_v36, 0.0004427343  ;;  %v1160_v45 = vmul.f32 -0.5, %v3194_v4  ;;  %v1175_v54 = vadd.f32 1.0, %v3213_v52 }
 0x20b   : > { %v2442_v29 = vpop.eup %2441  ;;  %2457 = vlog2.f32 %v1148_v37  ;;  %v930_v12 = vsub.f32 0.0, %v898_v22  ;;  %v1143_v56 = vadd.f32 1.0, %v1142_v34  ;;  %v1151_v8 = vmul.f32 -0.5, %v3198_v14 }
 0x20c   : > { %2084 = vst [vmem:[%s3037_s17 + $0x28] sm:$0xff] %v2028_v17   ;;  %v3221_v28 = vpop.eup %2443  ;;  %v1123_v3 = vmul.f32 0.6931472, %v2442_v29  ;;  %v1117_v10 = vmul.f32 %v3173_v46, %v1116_v0  ;;  %v1134_v35 = vadd.f32 1.0, %v1133_v39  ;;  %2459 = vlog2.f32 %v1175_v54 }
 0x20d   : > { %v3231_v32 = vpop.eup %2445  ;;  %v1166_v57 = vadd.f32 1.0, %v3221_v28  ;;  %vm3242_vm11 = vcmp.lt.f32.partialorder %v1145_v40, 0.0004427343  ;;  %vm3246_vm12 = vcmp.lt.f32.partialorder %v1136_v11, 0.0004427343  ;;  %v1161_v50 = vadd.f32 1.0, %v1160_v45 }
 0x20e   : > { %v1129_v44 = vsel %vm3206_vm8, %v1126_v63, %v1123_v3  ;;  %v3237_v27 = vpop.eup %2447  ;;  %v1163_v6 = vand.u32 2147483647, %v3194_v4  ;;  %v1193_v46 = vadd.f32 1.0, %v3231_v32  ;;  %v1144_v17 = vmul.f32 %v3181_v53, %v1143_v56 }
 0x20f   : > { %v1305_v13 = vadd.f32 %v1129_v44, %v857_v43  ;;  %2461 = vlog2.f32 %v1166_v57  ;;  %v1154_v43 = vand.u32 2147483647, %v3198_v14  ;;  %v1152_v36 = vadd.f32 1.0, %v1151_v8 }
 0x210   : > { %v1178_v55 = vmul.f32 -0.5, %v3213_v52  ;;  %v1184_v22 = vadd.f32 1.0, %v3237_v27  ;;  %v1135_v63 = vmul.f32 %v3185_v5, %v1134_v35  ;;  %v1181_v34 = vand.u32 2147483647, %v3213_v52 }
 0x211   : > { %v3251_v19 = vadd.f32 1e-08, %v1305_v13  ;;  %v2450_v23 = vpop.eup %2449  ;;  %v1169_v37 = vmul.f32 -0.5, %v3221_v28  ;;  %vm3262_vm13 = vcmp.lt.f32.partialorder %v1163_v6, 0.0004427343  ;;  %v1162_v11 = vmul.f32 %v3194_v4, %v1161_v50 }
 0x212   : > { %v1114_v0 = vmul.f32 0.6931472, %v2450_v23  ;;  %v1172_v53 = vand.u32 2147483647, %v3221_v28  ;;  %vm3268_vm14 = vcmp.lt.f32.partialorder %v1154_v43, 0.0004427343  ;;  %v1153_v44 = vmul.f32 %v3198_v14, %v1152_v36  ;;  %v3297_v23 = vpop.f32.mrf.mxu1 }
 0x213   : > { %2463 = vrsqrt.f32 %v3251_v19  ;;  %v2452_v29 = vpop.eup %2451  ;;  %v1179_v56 = vadd.f32 1.0, %v1178_v55  ;;  %vm3279_vm15 = vcmp.lt.f32.partialorder %v1181_v34, 0.0004427343  ;;  %v1170_v13 = vadd.f32 1.0, %v1169_v37 }
 0x214   : > { %2465 = vlog2.f32 %v1193_v46  ;;  %v2454_v3 = vpop.eup %2453  ;;  %v1141_v40 = vmul.f32 0.6931472, %v2452_v29  ;;  %v1120_v5 = vsel %vm3225_vm9, %v1117_v10, %v1114_v0  ;;  %v1196_v35 = vmul.f32 -0.5, %v3231_v32 }
 0x215   : > { %2467 = vlog2.f32 %v1184_v22  ;;  %v1132_v54 = vmul.f32 0.6931472, %v2454_v3  ;;  %v1304_v8 = vadd.f32 %v1120_v5, %v856_v18  ;;  %vm3288_vm0 = vcmp.lt.f32.partialorder %v1172_v53, 0.0004427343 }
 0x216   : > { %v1147_v57 = vsel %vm3242_vm11, %v1144_v17, %v1141_v40  ;;  %v2456_v6 = vpop.eup %2455  ;;  %2469 = vpow2.f32 %v986_v24  ;;  %v1199_v46 = vand.u32 2147483647, %v3231_v32  ;;  %v1180_v17 = vmul.f32 %v3213_v52, %v1179_v56 }
 0x217   : > { %v1307_v48 = vadd.f32 %v1147_v57, %v859_v21  ;;  %v1138_v14 = vsel %vm3246_vm12, %v1135_v63, %v1132_v54  ;;  %v3292_v60 = vadd.f32 1e-08, %v1304_v8  ;;  %v1159_v43 = vmul.f32 0.6931472, %v2456_v6 }
 0x218   : > { %v2458_v18 = vpop.eup %2457  ;;  %v1306_v50 = vadd.f32 %v1138_v14, %v858_v25  ;;  %v984_v36 = vmul.f32 1.442695, %v930_v12  ;;  %vm1449_vm1 = vcmp.eq.f32.partialorder %v3251_v19, inf  ;;  %v1171_v24 = vmul.f32 %v3221_v28, %v1170_v13 }
 0x219   : > { %v3299_v21 = vadd.f32 1e-08, %v1307_v48  ;;  %v1150_v9 = vmul.f32 0.6931472, %v2458_v18  ;;  %2471 = vrsqrt.f32 %v3292_v60  ;;  %v1187_v55 = vmul.f32 -0.5, %v3237_v27  ;;  %v2460_v25 = vpop.eup %2459 }
 0x21a   : > { %v1197_v22 = vadd.f32 1.0, %v1196_v35  ;;  %v1190_v63 = vand.u32 2147483647, %v3237_v27  ;;  %v901_v34 = vand.u32 2147483647, %v3297_v23  ;;  %v1165_v52 = vsel %vm3262_vm13, %v1162_v11, %v1159_v43 }
 0x21b   : > { %2473 = vrsqrt.f32 %v3299_v21  ;;  %v3309_v29 = vadd.f32 1e-08, %v1306_v50  ;;  %v1156_v12 = vsel %vm3268_vm14, %v1153_v44, %v1150_v9  ;;  %v1177_v28 = vmul.f32 0.6931472, %v2460_v25 }
 0x21c   : > { %v2462_v37 = vpop.eup %2461  ;;  %v1309_v0 = vadd.f32 %v1165_v52, %v861_v15  ;;  %v1308_v53 = vadd.f32 %v1156_v12, %v860_v16  ;;  %2475 = vpow2.f32 %v984_v36  ;;  %vm1451_vm2 = vcmp.eq.f32.partialorder %v3251_v19, 0.0 }
 0x21d   : > { %v1168_v3 = vmul.f32 0.6931472, %v2462_v37  ;;  %v1452_v40 = vand.u32 2147483648, %v3251_v19  ;;  %2477 = vrsqrt.f32 %v3309_v29  ;;  %v1188_v39 = vadd.f32 1.0, %v1187_v55 }
 0x21e   : > { %v3322_v5 = vadd.f32 1e-08, %v1309_v0  ;;  %v3324_v45 = vadd.f32 1e-08, %v1308_v53  ;;  %v1183_v15 = vsel %vm3279_vm15, %v1180_v17, %v1177_v28  ;;  %v933_v57 = vsub.f32 0.0, %v901_v34 }
 0x21f   : > { %v1174_v16 = vsel %vm3288_vm0, %v1171_v24, %v1168_v3  ;;  %v1311_v56 = vadd.f32 %v1183_v15, %v863_v61  ;;  %v1198_v35 = vmul.f32 %v3231_v32, %v1197_v22  ;;  %vm3337_vm3 = vcmp.lt.f32.partialorder %v1199_v46, 0.0004427343 }
 0x220   : > { %v2464_v11 = vpop.eup %2463  ;;  %v1310_v8 = vadd.f32 %v1174_v16, %v862_v62  ;;  %2479 = vrsqrt.f32 %v3322_v5  ;;  %vm3341_vm4 = vcmp.lt.f32.partialorder %v1190_v63, 0.0004427343  ;;  %vm1442_vm5 = vcmp.eq.f32.partialorder %v3292_v60, inf }
 0x221   : > { %v2466_v54 = vpop.eup %2465  ;;  %v1448_v44 = vmul.f32 %v2464_v11, %v3251_v19  ;;  %2481 = vrsqrt.f32 %v3324_v45  ;;  %v1189_v62 = vmul.f32 %v3237_v27, %v1188_v39  ;;  %vm1444_vm6 = vcmp.eq.f32.partialorder %v3292_v60, 0.0 }
 0x222   : > { %v2468_v13 = vpop.eup %2467  ;;  %v1445_v32 = vand.u32 2147483648, %v3292_v60  ;;  %v3353_v48 = vadd.f32 1e-08, %v1311_v56  ;;  %v3355_v14 = vadd.f32 1e-08, %v1310_v8  ;;  %vm1463_vm7 = vcmp.eq.f32.partialorder %v3299_v21, inf }
 0x223   : > { %v1450_v61 = vsel %vm1449_vm1, %v3251_v19, %v1448_v44  ;;  %v3357_v10 = vpop.eup %2469  ;;  %v1195_v50 = vmul.f32 0.6931472, %v2466_v54  ;;  %v1186_v43 = vmul.f32 0.6931472, %v2468_v13  ;;  %v990_v46 = vmul.f32 1.442695, %v933_v57 }
 0x224   : > { %v1453_v18 = vsel %vm1451_vm2, %v1452_v40, %v1450_v61  ;;  %vm1465_vm8 = vcmp.eq.f32.partialorder %v3299_v21, 0.0  ;;  %v1466_v27 = vand.u32 2147483648, %v3299_v21  ;;  %2483 = vrsqrt.f32 %v3353_v48 }
 0x225   : > { %vm1456_vm9 = vcmp.eq.f32.partialorder %v3309_v29, inf  ;;  %vm1458_vm11 = vcmp.eq.f32.partialorder %v3309_v29, 0.0  ;;  %v1459_v9 = vand.u32 2147483648, %v3309_v29  ;;  %2485 = vrsqrt.f32 %v3355_v14 }
 0x226   : > { %v2472_v19 = vpop.eup %2471  ;;  %v1593_v17 = vmax.f32 %v1453_v18, 1e-05  ;;  %v1201_v36 = vsel %vm3337_vm3, %v1198_v35, %v1195_v50  ;;  %v1192_v24 = vsel %vm3341_vm4, %v1189_v62, %v1186_v43  ;;  %v1211_v55 = vadd.f32 1.0, %v3357_v10  ;;  %v3416_v35 = vpop.f32.mrf.mxu1 }
 0x227   : > { %v1441_v22 = vmul.f32 %v2472_v19, %v3292_v60  ;;  %vm1477_vm12 = vcmp.eq.f32.partialorder %v3322_v5, inf  ;;  %v1313_v63 = vadd.f32 %v1201_v36, %v865_v51  ;;  %v1312_v34 = vadd.f32 %v1192_v24, %v864_v30 }
 0x228   : > { %v2474_v25 = vpop.eup %2473  ;;  %2487 = vpow2.f32 %v990_v46  ;;  %vm1479_vm13 = vcmp.eq.f32.partialorder %v3322_v5, 0.0  ;;  %v1480_v52 = vand.u32 2147483648, %v3322_v5  ;;  %vm1470_vm14 = vcmp.eq.f32.partialorder %v3324_v45, inf  ;;  %v3441_v24 = vpop.f32.mrf.mxu1 }
 0x229   : > { %v1462_v37 = vmul.f32 %v2474_v25, %v3299_v21  ;;  %2489 = vlog2.f32 %v1211_v55  ;;  %v3384_v12 = vpop.eup %2475  ;;  %v1443_v28 = vsel %vm1442_vm5, %v3292_v60, %v1441_v22  ;;  %vm1472_vm15 = vcmp.eq.f32.partialorder %v3324_v45, 0.0 }
 0x22a   : > { %v1473_v51 = vand.u32 2147483648, %v3324_v45  ;;  %v3391_v30 = vadd.f32 1e-08, %v1313_v63  ;;  %v3393_v0 = vadd.f32 1e-08, %v1312_v34  ;;  %v2478_v53 = vpop.eup %2477  ;;  %v1625_v3 = vmin.f32 %v1593_v17, 100000.0 }
 0x22b   : > { %v1446_v40 = vsel %vm1444_vm6, %v1445_v32, %v1443_v28  ;;  %v1464_v39 = vsel %vm1463_vm7, %v3299_v21, %v1462_v37  ;;  %v1494_v11 = vand.u32 2147483648, %v3353_v48  ;;  %v1455_v54 = vmul.f32 %v2478_v53, %v3309_v29 }
 0x22c   : > { %v1592_v15 = vmax.f32 %v1446_v40, 1e-05  ;;  %v1467_v16 = vsel %vm1465_vm8, %v1466_v27, %v1464_v39  ;;  %vm1491_vm0 = vcmp.eq.f32.partialorder %v3353_v48, inf  ;;  %2491 = vrsqrt.f32 %v3391_v30 }
 0x22d   : > { %v1595_v44 = vmax.f32 %v1467_v16, 1e-05  ;;  %vm1493_vm1 = vcmp.eq.f32.partialorder %v3353_v48, 0.0  ;;  %vm1484_vm2 = vcmp.eq.f32.partialorder %v3355_v14, inf  ;;  %v1214_v60 = vmul.f32 -0.5, %v3357_v10  ;;  %v2480_v8 = vpop.eup %2479 }
 0x22e   : > { %v1217_v56 = vand.u32 2147483647, %v3357_v10  ;;  %v1624_v57 = vmin.f32 %v1592_v15, 100000.0  ;;  %v1457_v21 = vsel %vm1456_vm9, %v3309_v29, %v1455_v54  ;;  %vm1486_vm3 = vcmp.eq.f32.partialorder %v3355_v14, 0.0  ;;  %v2482_v4 = vpop.eup %2481  ;;  %v3467_v15 = vpop.f32.mrf.mxu1 }
 0x22f   : > { %2493 = vrsqrt.f32 %v3393_v0  ;;  %v1202_v13 = vadd.f32 1.0, %v3384_v12  ;;  %v1657_v6 = vsel %vm3007_vm10, %v1625_v3, %v2930_v59  ;;  %v1460_v61 = vsel %vm1458_vm11, %v1459_v9, %v1457_v21 }
 0x230   : > { %v1476_v62 = vmul.f32 %v2480_v8, %v3322_v5  ;;  %v1487_v32 = vand.u32 2147483648, %v3355_v14  ;;  %v1656_v18 = vsel %vm3007_vm10, %v1624_v57, %v2980_v41  ;;  %v1627_v50 = vmin.f32 %v1595_v44, 100000.0 }
 0x231   : > { %v1594_v43 = vmax.f32 %v1460_v61, 1e-05  ;;  %v1469_v46 = vmul.f32 %v2482_v4, %v3324_v45  ;;  %v2033_v27 = vpack.c.bf16 %v1657_v6, %v1656_v18  ;;  %v1215_v29 = vadd.f32 1.0, %v1214_v60  ;;  %v2484_v19 = vpop.eup %2483  ;;  %v3486_v61 = vpop.f32.mrf.mxu1 }
 0x232   : > { %v1478_v59 = vsel %vm1477_vm12, %v3322_v5, %v1476_v62  ;;  %vm3432_vm4 = vcmp.lt.f32.partialorder %v1217_v56, 0.0004427343  ;;  %2495 = vlog2.f32 %v1202_v13  ;;  %v2486_v55 = vpop.eup %2485  ;;  %v1490_v63 = vmul.f32 %v2484_v19, %v3353_v48 }
 0x233   : > { %v1626_v17 = vmin.f32 %v1594_v43, 100000.0  ;;  %v1481_v36 = vsel %vm1479_vm13, %v1480_v52, %v1478_v59  ;;  %v1471_v41 = vsel %vm1470_vm14, %v3324_v45, %v1469_v46  ;;  %2085 = vst [vmem:[%s3037_s17 + $0x30] sm:$0xff] %v2033_v27   ;;  %vm1505_vm5 = vcmp.eq.f32.partialorder %v3391_v30, inf }
 0x234   : > { %v1597_v25 = vmax.f32 %v1481_v36, 1e-05  ;;  %v1474_v22 = vsel %vm1472_vm15, %v1473_v51, %v1471_v41  ;;  %v1659_v5 = vsel %vm3007_vm10, %v1627_v50, %v3001_v58  ;;  %v1483_v52 = vmul.f32 %v2486_v55, %v3355_v14 }
 0x235   : > { %v1658_v34 = vsel %vm3007_vm10, %v1626_v17, %v3047_v20  ;;  %v1596_v37 = vmax.f32 %v1474_v22, 1e-05  ;;  %v3455_v28 = vpop.eup %2487  ;;  %v1492_v53 = vsel %vm1491_vm0, %v3353_v48, %v1490_v63  ;;  %vm1507_vm6 = vcmp.eq.f32.partialorder %v3391_v30, 0.0 }
 0x236   : > { %v2038_v45 = vpack.c.bf16 %v1659_v5, %v1658_v34  ;;  %v1629_v51 = vmin.f32 %v1597_v25, 100000.0  ;;  %v2490_v3 = vpop.eup %2489  ;;  %v1495_v58 = vsel %vm1493_vm1, %v1494_v11, %v1492_v53  ;;  %v1485_v20 = vsel %vm1484_vm2, %v3355_v14, %v1483_v52 }
 0x237   : > { %v1628_v40 = vmin.f32 %v1596_v37, 100000.0  ;;  %v1216_v39 = vmul.f32 %v3357_v10, %v1215_v29  ;;  %v1599_v16 = vmax.f32 %v1495_v58, 1e-05  ;;  %v1488_v54 = vsel %vm1486_vm3, %v1487_v32, %v1485_v20 }
 0x238   : > { %2086 = vst [vmem:[%s3037_s17 + $0x38] sm:$0xff] %v2038_v45   ;;  %v1213_v44 = vmul.f32 0.6931472, %v2490_v3  ;;  %v1205_v60 = vmul.f32 -0.5, %v3384_v12  ;;  %v1661_v48 = vsel %vm3007_vm10, %v1629_v51, %v3072_v47  ;;  %v1598_v10 = vmax.f32 %v1488_v54, 1e-05 }
 0x239   : > { %v1660_v11 = vsel %vm3007_vm10, %v1628_v40, %v3093_v26  ;;  %v1229_v56 = vadd.f32 1.0, %v3455_v28  ;;  %v2492_v8 = vpop.eup %2491  ;;  %v1631_v21 = vmin.f32 %v1599_v16, 100000.0  ;;  %v1508_v14 = vand.u32 2147483648, %v3391_v30 }
 0x23a   : > { %v2043_v57 = vpack.c.bf16 %v1661_v48, %v1660_v11  ;;  %v1219_v13 = vsel %vm3432_vm4, %v1216_v39, %v1213_v44  ;;  %v1630_v4 = vmin.f32 %v1598_v10, 100000.0  ;;  %v1504_v6 = vmul.f32 %v2492_v8, %v3391_v30 }
 0x23b   : > { %v1315_v47 = vadd.f32 %v1219_v13, %v867_v31  ;;  %2497 = vlog2.f32 %v1229_v56  ;;  %v1663_v62 = vsel %vm3007_vm10, %v1631_v21, %v3114_v38  ;;  %vm1498_vm7 = vcmp.eq.f32.partialorder %v3393_v0, inf }
 0x23c   : > { %v2494_v26 = vpop.eup %2493  ;;  %2087 = vst [vmem:[%s3037_s17 + $0x40] sm:$0xff] %v2043_v57   ;;  %v1206_v32 = vadd.f32 1.0, %v1205_v60  ;;  %v900_v18 = vand.u32 2147483647, %v3416_v35  ;;  %v1662_v50 = vsel %vm3007_vm10, %v1630_v4, %v3130_v42  ;;  %v1506_v31 = vsel %vm1505_vm5, %v3391_v30, %v1504_v6  ;;  %v3510_v42 = vpop.f32.mrf.mxu1 }
 0x23d   : > { %v1497_v43 = vmul.f32 %v2494_v26, %v3393_v0  ;;  %v3501_v46 = vadd.f32 1e-08, %v1315_v47  ;;  %v2048_v27 = vpack.c.bf16 %v1663_v62, %v1662_v50  ;;  %v1509_v38 = vsel %vm1507_vm6, %v1508_v14, %v1506_v31 }
 0x23e   : > { %v1501_v59 = vand.u32 2147483648, %v3393_v0  ;;  %v1208_v29 = vand.u32 2147483647, %v3384_v12  ;;  %v1601_v9 = vmax.f32 %v1509_v38, 1e-05  ;;  %vm1500_vm8 = vcmp.eq.f32.partialorder %v3393_v0, 0.0  ;;  %v3518_v51 = vpop.f32.mrf.mxu1 }
 0x23f   : > { %v1499_v19 = vsel %vm1498_vm7, %v3393_v0, %v1497_v43  ;;  %2499 = vrsqrt.f32 %v3501_v46  ;;  %v2496_v17 = vpop.eup %2495  ;;  %2088 = vst [vmem:[%s3037_s17 + $0x48] sm:$0xff] %v2048_v27   ;;  %v866_v41 = vmax.f32 %v3192_v7, 0.0  ;;  %v932_v30 = vsub.f32 0.0, %v900_v18 }
 0x240   : > { %v1502_v36 = vsel %vm1500_vm8, %v1501_v59, %v1499_v19  ;;  %v1633_v55 = vmin.f32 %v1601_v9, 100000.0  ;;  %v1204_v22 = vmul.f32 0.6931472, %v2496_v17  ;;  %v1207_v63 = vmul.f32 %v3384_v12, %v1206_v32  ;;  %v3529_v8 = vpop.f32.mrf.mxu1 }
 0x241   : > { %v1600_v25 = vmax.f32 %v1502_v36, 1e-05  ;;  %vm1209_vm9 = vcmp.lt.f32.partialorder %v1208_v29, 0.0004427343  ;;  %v988_v5 = vmul.f32 1.442695, %v932_v30 }
 0x242   : > { %v903_v34 = vand.u32 2147483647, %v3441_v24  ;;  %v1210_v37 = vsel %vm1209_vm9, %v1207_v63, %v1204_v22  ;;  %v1232_v52 = vmul.f32 -0.5, %v3455_v28  ;;  %v902_v45 = vand.u32 2147483647, %v3467_v15 }
 0x243   : > { %v1632_v0 = vmin.f32 %v1600_v25, 100000.0  ;;  %v1314_v53 = vadd.f32 %v1210_v37, %v866_v41  ;;  %2501 = vpow2.f32 %v988_v5  ;;  %v905_v40 = vand.u32 2147483647, %v3486_v61 }
 0x244   : > { %v935_v3 = vsub.f32 0.0, %v903_v34  ;;  %v1665_v12 = vsel %vm3007_vm10, %v1633_v55, %v3140_v49  ;;  %v934_v20 = vsub.f32 0.0, %v902_v45  ;;  %v904_v39 = vand.u32 2147483647, %v3510_v42 }
 0x245   : > { %v1664_v58 = vsel %vm3007_vm10, %v1632_v0, %v3151_v2  ;;  %v1346_v54 = vadd.f32 1e-08, %v1314_v53  ;;  %v937_v60 = vsub.f32 0.0, %v905_v40  ;;  %v1233_v48 = vadd.f32 1.0, %v1232_v52 }
 0x246   : > { %v2053_v16 = vpack.c.bf16 %v1665_v12, %v1664_v58  ;;  %v994_v44 = vmul.f32 1.442695, %v935_v3  ;;  %v992_v11 = vmul.f32 1.442695, %v934_v20  ;;  %v936_v10 = vsub.f32 0.0, %v904_v39 }
 0x247   : > { %v907_v56 = vand.u32 2147483647, %v3518_v51  ;;  %2503 = vrsqrt.f32 %v1346_v54  ;;  %v1235_v49 = vand.u32 2147483647, %v3455_v28  ;;  %v998_v21 = vmul.f32 1.442695, %v937_v60 }
 0x248   : > { %v2498_v57 = vpop.eup %2497  ;;  %2089 = vst [vmem:[%s3037_s17 + $0x50] sm:$0xff] %v2053_v16   ;;  %2505 = vpow2.f32 %v994_v44  ;;  %v996_v14 = vmul.f32 1.442695, %v936_v10  ;;  %v906_v4 = vand.u32 2147483647, %v3529_v8  ;;  %v1234_v6 = vmul.f32 %v3455_v28, %v1233_v48 }
 0x249   : > { %v1231_v2 = vmul.f32 0.6931472, %v2498_v57  ;;  %2507 = vpow2.f32 %v992_v11  ;;  %v939_v13 = vsub.f32 0.0, %v907_v56  ;;  %vm1236_vm11 = vcmp.lt.f32.partialorder %v1235_v49, 0.0004427343 }
 0x24a   : > { %2509 = vpow2.f32 %v998_v21  ;;  %v938_v62 = vsub.f32 0.0, %v906_v4  ;;  %v869_v50 = vmax.f32 %v3297_v23, 0.0  ;;  %vm1519_vm12 = vcmp.eq.f32.partialorder %v3501_v46, inf }
 0x24b   : > { %2511 = vpow2.f32 %v996_v14  ;;  %v1002_v26 = vmul.f32 1.442695, %v939_v13  ;;  %v1237_v18 = vsel %vm1236_vm11, %v1234_v6, %v1231_v2  ;;  %v1522_v28 = vand.u32 2147483648, %v3501_v46 }
 0x24c   : > { %v2500_v47 = vpop.eup %2499  ;;  %v1000_v31 = vmul.f32 1.442695, %v938_v62  ;;  %v1317_v27 = vadd.f32 %v1237_v18, %v869_v50  ;;  %vm1521_vm13 = vcmp.eq.f32.partialorder %v3501_v46, 0.0  ;;  %vm1512_vm14 = vcmp.eq.f32.partialorder %v1346_v54, inf }
 0x24d   : > { %v1518_v32 = vmul.f32 %v2500_v47, %v3501_v46  ;;  %2513 = vpow2.f32 %v1002_v26  ;;  %v1515_v55 = vand.u32 2147483648, %v1346_v54  ;;  %vm1514_vm15 = vcmp.eq.f32.partialorder %v1346_v54, 0.0 }
 0x24e   : > { %2515 = vpow2.f32 %v1000_v31  ;;  %v3541_v9 = vadd.f32 1e-08, %v1317_v27  ;;  %v871_v47 = vmax.f32 %v3441_v24, 0.0  ;;  %v870_v18 = vmax.f32 %v3467_v15, 0.0 }
 0x24f   : > { %v1520_v43 = vsel %vm1519_vm12, %v3501_v46, %v1518_v32  ;;  %v873_v50 = vmax.f32 %v3486_v61, 0.0  ;;  %v872_v31 = vmax.f32 %v3510_v42, 0.0 }
 0x250   : > { %v2502_v38 = vpop.eup %2501  ;;  %v1523_v29 = vsel %vm1521_vm13, %v1522_v28, %v1520_v43  ;;  %vm1533_vm3 = vcmp.eq.f32.partialorder %v3541_v9, inf  ;;  %vm1535_vm6 = vcmp.eq.f32.partialorder %v3541_v9, 0.0 }
 0x251   : > { %v1220_v59 = vadd.f32 1.0, %v2502_v38  ;;  %v1603_v36 = vmax.f32 %v1523_v29, 1e-05  ;;  %v1223_v52 = vmul.f32 -0.5, %v2502_v38 }
 0x253   : > { %2517 = vlog2.f32 %v1220_v59  ;;  %v1635_v0 = vmin.f32 %v1603_v36, 100000.0  ;;  %v1224_v39 = vadd.f32 1.0, %v1223_v52 }
 0x254   : > { %v2504_v19 = vpop.eup %2503  ;;  %2519 = vrsqrt.f32 %v3541_v9 }
 0x255   : > { %v2506_v17 = vpop.eup %2505  ;;  %v1511_v41 = vmul.f32 %v2504_v19, %v1346_v54  ;;  %v1667_v58 = vsel %vm3007_vm10, %v1635_v0, %v3168_v33  ;;  %v868_v33 = vmax.f32 %v3416_v35, 0.0  ;;  %v1225_v57 = vmul.f32 %v2502_v38, %v1224_v39 }
 0x256   : > { %v3543_v30 = vpop.eup %2507  ;;  %v1247_v25 = vadd.f32 1.0, %v2506_v17  ;;  %v1250_v44 = vmul.f32 -0.5, %v2506_v17  ;;  %v1253_v49 = vand.u32 2147483647, %v2506_v17 }
 0x257   : > { %v3545_v22 = vpop.eup %2509  ;;  %v1513_v63 = vsel %vm1512_vm14, %v1346_v54, %v1511_v41  ;;  %v1238_v46 = vadd.f32 1.0, %v3543_v30  ;;  %v1226_v54 = vand.u32 2147483647, %v2502_v38  ;;  %v1241_v48 = vmul.f32 -0.5, %v3543_v30 }
 0x258   : > { %v3549_v5 = vpop.eup %2511  ;;  %v1516_v34 = vsel %vm1514_vm15, %v1515_v55, %v1513_v63  ;;  %2521 = vlog2.f32 %v1247_v25  ;;  %v1265_v45 = vadd.f32 1.0, %v3545_v22  ;;  %v1268_v2 = vmul.f32 -0.5, %v3545_v22 }
 0x259   : > { %v1602_v37 = vmax.f32 %v1516_v34, 1e-05  ;;  %2523 = vlog2.f32 %v1238_v46  ;;  %v1256_v40 = vadd.f32 1.0, %v3549_v5  ;;  %vm1227_vm0 = vcmp.lt.f32.partialorder %v1226_v54, 0.0004427343 }
 0x25a   : > { %v3552_v53 = vpop.eup %2513  ;;  %2525 = vlog2.f32 %v1265_v45  ;;  %v1242_v14 = vadd.f32 1.0, %v1241_v48  ;;  %v1259_v13 = vmul.f32 -0.5, %v3549_v5  ;;  %v1244_v26 = vand.u32 2147483647, %v3543_v30 }
 0x25b   : > { %v1634_v3 = vmin.f32 %v1602_v37, 100000.0  ;;  %v3555_v12 = vpop.eup %2515  ;;  %2527 = vlog2.f32 %v1256_v40  ;;  %v1283_v60 = vadd.f32 1.0, %v3552_v53  ;;  %vm3572_vm1 = vcmp.lt.f32.partialorder %v1253_v49, 0.0004427343 }
 0x25c   : > { %v1274_v10 = vadd.f32 1.0, %v3555_v12  ;;  %v1269_v59 = vadd.f32 1.0, %v1268_v2  ;;  %v1243_v19 = vmul.f32 %v3543_v30, %v1242_v14  ;;  %v1271_v36 = vand.u32 2147483647, %v3545_v22 }
 0x25d   : > { %v1666_v20 = vsel %vm3007_vm10, %v1634_v3, %v3192_v7  ;;  %2529 = vlog2.f32 %v1283_v60  ;;  %v1251_v7 = vadd.f32 1.0, %v1250_v44  ;;  %v1260_v41 = vadd.f32 1.0, %v1259_v13 }
 0x25e   : > { %v2058_v16 = vpack.c.bf16 %v1667_v58, %v1666_v20  ;;  %2531 = vlog2.f32 %v1274_v10  ;;  %vm1245_vm2 = vcmp.lt.f32.partialorder %v1244_v26, 0.0004427343  ;;  %v1262_v25 = vand.u32 2147483647, %v3549_v5 }
 0x25f   : > { %v1252_v28 = vmul.f32 %v2506_v17, %v1251_v7  ;;  %v1286_v17 = vmul.f32 -0.5, %v3552_v53  ;;  %v1277_v0 = vmul.f32 -0.5, %v3555_v12  ;;  %v1270_v3 = vmul.f32 %v3545_v22, %v1269_v59 }
 0x260   : > { %v2518_v11 = vpop.eup %2517  ;;  %2090 = vst [vmem:[%s3037_s17 + $0x58] sm:$0xff] %v2058_v16   ;;  %vm1272_vm4 = vcmp.lt.f32.partialorder %v1271_v36, 0.0004427343  ;;  %v1261_v58 = vmul.f32 %v3549_v5, %v1260_v41  ;;  %vm1263_vm5 = vcmp.lt.f32.partialorder %v1262_v25, 0.0004427343  ;;  %v875_v14 = vmax.f32 %v3518_v51, 0.0 }
 0x261   : > { %v1222_v56 = vmul.f32 0.6931472, %v2518_v11  ;;  %v2520_v4 = vpop.eup %2519  ;;  %v1287_v48 = vadd.f32 1.0, %v1286_v17  ;;  %v1278_v11 = vadd.f32 1.0, %v1277_v0  ;;  %v1289_v22 = vand.u32 2147483647, %v3552_v53 }
 0x262   : > { %v1532_v55 = vmul.f32 %v2520_v4, %v3541_v9 }
 0x263   : > { %v1228_v21 = vsel %vm1227_vm0, %v1225_v57, %v1222_v56  ;;  %v1536_v56 = vand.u32 2147483648, %v3541_v9  ;;  %v1288_v13 = vmul.f32 %v3552_v53, %v1287_v48  ;;  %v1279_v4 = vmul.f32 %v3555_v12, %v1278_v11 }
 0x264   : > { %v1316_v6 = vadd.f32 %v1228_v21, %v868_v33  ;;  %v1534_v10 = vsel %vm1533_vm3, %v3541_v9, %v1532_v55  ;;  %v1280_v33 = vand.u32 2147483647, %v3555_v12  ;;  %vm1290_vm7 = vcmp.lt.f32.partialorder %v1289_v22, 0.0004427343 }
 0x265   : > { %v2522_v62 = vpop.eup %2521  ;;  %v1537_v21 = vsel %vm1535_vm6, %v1536_v56, %v1534_v10 }
 0x266   : > { %v2524_v43 = vpop.eup %2523  ;;  %v3579_v27 = vadd.f32 1e-08, %v1316_v6  ;;  %v1249_v38 = vmul.f32 0.6931472, %v2522_v62  ;;  %v874_v6 = vmax.f32 %v3529_v8, 0.0 }
 0x267   : > { %v1240_v29 = vmul.f32 0.6931472, %v2524_v43  ;;  %v2526_v63 = vpop.eup %2525  ;;  %vm1281_vm8 = vcmp.lt.f32.partialorder %v1280_v33, 0.0004427343  ;;  %v1605_v62 = vmax.f32 %v1537_v21, 1e-05 }
 0x268   : > { %2533 = vrsqrt.f32 %v3579_v27  ;;  %v1255_v46 = vsel %vm3572_vm1, %v1252_v28, %v1249_v38  ;;  %v2528_v30 = vpop.eup %2527  ;;  %v1267_v45 = vmul.f32 0.6931472, %v2526_v63  ;;  %vm1526_vm9 = vcmp.eq.f32.partialorder %v3579_v27, inf }
 0x269   : > { %v1246_v34 = vsel %vm1245_vm2, %v1243_v19, %v1240_v29  ;;  %v1319_v37 = vadd.f32 %v1255_v46, %v871_v47  ;;  %v1258_v40 = vmul.f32 0.6931472, %v2528_v30  ;;  %v1529_v43 = vand.u32 2147483648, %v3579_v27 }
 0x26a   : > { %v1318_v52 = vadd.f32 %v1246_v34, %v870_v18  ;;  %v1273_v16 = vsel %vm1272_vm4, %v1270_v3, %v1267_v45  ;;  %v2530_v54 = vpop.eup %2529  ;;  %v1637_v38 = vmin.f32 %v1605_v62, 100000.0  ;;  %vm1528_vm11 = vcmp.eq.f32.partialorder %v3579_v27, 0.0 }
 0x26b   : > { %v3593_v20 = vadd.f32 1e-08, %v1319_v37  ;;  %v1321_v44 = vadd.f32 %v1273_v16, %v873_v50  ;;  %v1264_v60 = vsel %vm1263_vm5, %v1261_v58, %v1258_v40  ;;  %v2532_v5 = vpop.eup %2531  ;;  %v1285_v7 = vmul.f32 0.6931472, %v2530_v54 }
 0x26c   : > { %v3595_v39 = vadd.f32 1e-08, %v1318_v52  ;;  %v1320_v49 = vadd.f32 %v1264_v60, %v872_v31  ;;  %v1276_v2 = vmul.f32 0.6931472, %v2532_v5  ;;  %v1669_v41 = vsel %vm3007_vm10, %v1637_v38, %v3297_v23 }
 0x26d   : > { %2535 = vrsqrt.f32 %v3593_v20  ;;  %v3604_v57 = vadd.f32 1e-08, %v1321_v44  ;;  %v1291_v47 = vsel %vm1290_vm7, %v1288_v13, %v1285_v7  ;;  %vm1547_vm12 = vcmp.eq.f32.partialorder %v3593_v20, inf }
 0x26e   : > { %2537 = vrsqrt.f32 %v3595_v39  ;;  %v3611_v9 = vadd.f32 1e-08, %v1320_v49  ;;  %v1282_v26 = vsel %vm1281_vm8, %v1279_v4, %v1276_v2  ;;  %v1323_v32 = vadd.f32 %v1291_v47, %v875_v14 }
 0x26f   : > { %2539 = vrsqrt.f32 %v3604_v57  ;;  %v1322_v18 = vadd.f32 %v1282_v26, %v874_v6  ;;  %vm1549_vm13 = vcmp.eq.f32.partialorder %v3593_v20, 0.0  ;;  %vm1540_vm14 = vcmp.eq.f32.partialorder %v3595_v39, inf }
 0x270   : > { %2541 = vrsqrt.f32 %v3611_v9  ;;  %v3615_v31 = vadd.f32 1e-08, %v1323_v32  ;;  %v1543_v23 = vand.u32 2147483648, %v3595_v39  ;;  %vm1542_vm15 = vcmp.eq.f32.partialorder %v3595_v39, 0.0 }
 0x271   : > { %v3617_v12 = vadd.f32 1e-08, %v1322_v18  ;;  %vm1561_vm0 = vcmp.eq.f32.partialorder %v3604_v57, inf  ;;  %vm1563_vm1 = vcmp.eq.f32.partialorder %v3604_v57, 0.0  ;;  %vm1554_vm2 = vcmp.eq.f32.partialorder %v3611_v9, inf }
 0x272   : > { %2543 = vrsqrt.f32 %v3615_v31  ;;  %v1557_v48 = vand.u32 2147483648, %v3611_v9  ;;  %vm1556_vm3 = vcmp.eq.f32.partialorder %v3611_v9, 0.0  ;;  %vm1575_vm4 = vcmp.eq.f32.partialorder %v3615_v31, inf }
 0x273   : > { %2545 = vrsqrt.f32 %v3617_v12  ;;  %v1578_v21 = vand.u32 2147483648, %v3615_v31  ;;  %vm1577_vm5 = vcmp.eq.f32.partialorder %v3615_v31, 0.0  ;;  %vm1568_vm6 = vcmp.eq.f32.partialorder %v3617_v12, inf }
 0x274   : > { %v1571_v14 = vand.u32 2147483648, %v3617_v12  ;;  %vm1570_vm7 = vcmp.eq.f32.partialorder %v3617_v12, 0.0 }
 0x275   : > { %v2534_v50 = vpop.eup %2533 }
 0x276   : > { %v1525_v53 = vmul.f32 %v2534_v50, %v3579_v27 }
 0x278   : > { %v1527_v28 = vsel %vm1526_vm9, %v3579_v27, %v1525_v53  ;;  %v1550_v27 = vand.u32 2147483648, %v3593_v20 }
 0x279   : > { %v1530_v59 = vsel %vm1528_vm11, %v1529_v43, %v1527_v28 }
 0x27a   : > { %v1604_v29 = vmax.f32 %v1530_v59, 1e-05  ;;  %v2536_v19 = vpop.eup %2535 }
 0x27b   : > { %v2538_v36 = vpop.eup %2537  ;;  %v1546_v25 = vmul.f32 %v2536_v19, %v3593_v20 }
 0x27c   : > { %v1636_v55 = vmin.f32 %v1604_v29, 100000.0  ;;  %v1539_v63 = vmul.f32 %v2538_v36, %v3595_v39  ;;  %v2540_v17 = vpop.eup %2539 }
 0x27d   : > { %v1548_v34 = vsel %vm1547_vm12, %v3593_v20, %v1546_v25  ;;  %v1560_v3 = vmul.f32 %v2540_v17, %v3604_v57  ;;  %v2542_v58 = vpop.eup %2541 }
 0x27e   : > { %v1668_v46 = vsel %vm3007_vm10, %v1636_v55, %v3416_v35  ;;  %v1551_v30 = vsel %vm1549_vm13, %v1550_v27, %v1548_v34  ;;  %v1541_v37 = vsel %vm1540_vm14, %v3595_v39, %v1539_v63  ;;  %v1564_v35 = vand.u32 2147483648, %v3604_v57 }
 0x27f   : > { %v2063_v0 = vpack.c.bf16 %v1669_v41, %v1668_v46  ;;  %v1607_v52 = vmax.f32 %v1551_v30, 1e-05  ;;  %v1544_v45 = vsel %vm1542_vm15, %v1543_v23, %v1541_v37  ;;  %v1562_v16 = vsel %vm1561_vm0, %v3604_v57, %v1560_v3  ;;  %v2544_v11 = vpop.eup %2543 }
 0x280   : > { %v1606_v40 = vmax.f32 %v1544_v45, 1e-05  ;;  %v1565_v44 = vsel %vm1563_vm1, %v1564_v35, %v1562_v16  ;;  %v1553_v39 = vmul.f32 %v2542_v58, %v3611_v9  ;;  %v2546_v5 = vpop.eup %2545  ;;  %v1574_v49 = vmul.f32 %v2544_v11, %v3615_v31 }
 0x281   : > { %2091 = vst [vmem:[%s3037_s17 + $0x60] sm:$0xff] %v2063_v0   ;;  %v1639_v20 = vmin.f32 %v1607_v52, 100000.0  ;;  %v1609_v60 = vmax.f32 %v1565_v44, 1e-05 }
 0x282   : > { %v1638_v54 = vmin.f32 %v1606_v40, 100000.0  ;;  %v1555_v33 = vsel %vm1554_vm2, %v3611_v9, %v1553_v39 }
 0x283   : > { %v1671_v10 = vsel %vm3007_vm10, %v1639_v20, %v3441_v24  ;;  %v1558_v57 = vsel %vm1556_vm3, %v1557_v48, %v1555_v33  ;;  %v1641_v7 = vmin.f32 %v1609_v60, 100000.0  ;;  %v1567_v24 = vmul.f32 %v2546_v5, %v3617_v12 }
 0x284   : > { %v1670_v22 = vsel %vm3007_vm10, %v1638_v54, %v3467_v15  ;;  %v1608_v2 = vmax.f32 %v1558_v57, 1e-05  ;;  %v1576_v15 = vsel %vm1575_vm4, %v3615_v31, %v1574_v49 }
 0x285   : > { %v2068_v56 = vpack.c.bf16 %v1671_v10, %v1670_v22  ;;  %v1579_v4 = vsel %vm1577_vm5, %v1578_v21, %v1576_v15  ;;  %v1569_v6 = vsel %vm1568_vm6, %v3617_v12, %v1567_v24  ;;  %v1673_v26 = vsel %vm3007_vm10, %v1641_v7, %v3486_v61 }
 0x286   : > { %v1640_v13 = vmin.f32 %v1608_v2, 100000.0  ;;  %v1611_v9 = vmax.f32 %v1579_v4, 1e-05  ;;  %v1572_v47 = vsel %vm1570_vm7, %v1571_v14, %v1569_v6 }
 0x287   : > { %2092 = vst [vmem:[%s3037_s17 + $0x68] sm:$0xff] %v2068_v56   ;;  %v1610_v32 = vmax.f32 %v1572_v47, 1e-05 }
 0x288   : > { %v1672_v62 = vsel %vm3007_vm10, %v1640_v13, %v3510_v42  ;;  %v1643_v50 = vmin.f32 %v1611_v9, 100000.0 }
 0x289   : > { %v2073_v18 = vpack.c.bf16 %v1673_v26, %v1672_v62  ;;  %v1642_v53 = vmin.f32 %v1610_v32, 100000.0 }
 0x28a   : > { %v1675_v31 = vsel %vm3007_vm10, %v1643_v50, %v3518_v51 }
 0x28b   : > { %2093 = vst [vmem:[%s3037_s17 + $0x70] sm:$0xff] %v2073_v18   ;;  %v1674_v12 = vsel %vm3007_vm10, %v1642_v53, %v3529_v8 }
 0x28c   : > { %v2078_v43 = vpack.c.bf16 %v1675_v31, %v1674_v12 }
 0x28e   : > { %2094 = vst [vmem:[%s3037_s17 + $0x78] sm:$0xff] %v2078_v43  }
 0x28f PF: > { %s14_s15 = sadd.s32 1, %s2553_s15  }
 0x290   : > { %p11_p4 = scmp.ge.s32.totalorder %s14_s15, 4  }
 0x292   :  { %13 = sbr.rel (!%p11_p4) target bundleno = 1 (0x1), region = 66 }

</bundles_post_ra>
